<compile_context>
chip_gen: v5e
topology: v5e:2x2
jax: 0.10.0
libtpu: 0.0.40
codegen_flags: <defaults>
</compile_context>

<pallas_src>
import functools
import math

import jax
import jax.numpy as jnp
from jax import lax
from jax.experimental import pallas as pl
from jax.experimental.pallas import tpu as pltpu

# ---------------------------------------------------------------------------
# Tiling / compiler knobs
# ---------------------------------------------------------------------------
ROW_TILE = 512     # max M (token-row) tile, auto-halved to fit the VMEM budget
K_TILE = 512       # target K (contraction) tile
N_TILE = 512       # target N tile for epilogue-free matmuls (QKV / lm head)
Q_TILE = 256       # target query tile for the attention core

_SMEM_SPEC = pl.BlockSpec(memory_space=pltpu.MemorySpace.SMEM)

_VMEM_BUDGET = None


def _vmem_budget():
    """~75% of physical VMEM: ~96 MiB on v5e/v6e (128 MiB), ~48 MiB on v7x (64 MiB)."""
    global _VMEM_BUDGET
    if _VMEM_BUDGET is None:
        try:
            cap = int(pltpu.get_tpu_info().vmem_capacity_bytes)
        except Exception:
            cap = 64 * 2 ** 20          # conservative fallback
        _VMEM_BUDGET = cap * 3 // 4
    return _VMEM_BUDGET


def _cparams(sem):
    return pltpu.CompilerParams(dimension_semantics=sem,
                                vmem_limit_bytes=_vmem_budget())


def _choose_tile(dim, target):
    """Largest of (target, target/2, target/4, 128) dividing dim, else full dim."""
    if dim <= target:
        return dim
    for t in (target, target // 2, target // 4, 128):
        if t >= 128 and dim % t == 0:
            return t
    return dim


# ---------------------------------------------------------------------------
# In-kernel math helpers
# ---------------------------------------------------------------------------
def _erf(x):
    # Abramowitz & Stegun 7.1.26, |err| < 1.5e-7 -> matches nn.GELU() (erf form)
    # within f32 tolerance. Uses only exp (EUP), guaranteed to lower in Mosaic.
    p = 0.3275911
    a1, a2, a3, a4, a5 = (0.254829592, -0.284496736, 1.421413741,
                          -1.453152027, 1.061405429)
    sgn = jnp.where(x >= 0.0, 1.0, -1.0)
    ax = jnp.abs(x)
    t = 1.0 / (1.0 + p * ax)
    poly = ((((a5 * t + a4) * t + a3) * t + a2) * t + a1) * t
    return sgn * (1.0 - poly * jnp.exp(-ax * ax))


def _gelu_exact(x):
    return 0.5 * x * (1.0 + _erf(x * 0.7071067811865476))


def _apply_threshold(y, alpha, gamma, beta, thr):
    # ImprovedEmergentThresholdLayer (eval mode): LayerNorm + adaptive gate + clamp.
    mean = jnp.mean(y, axis=-1, keepdims=True)
    var = jnp.mean((y - mean) ** 2, axis=-1, keepdims=True)   # biased, LayerNorm-style
    yn = (y - mean) * lax.rsqrt(var + 1e-5)                   # torch LayerNorm eps
    yn = yn * gamma + beta
    gate = jax.nn.sigmoid(jnp.abs(yn) - thr)
    out = alpha * (gate * y) + (1.0 - alpha) * y
    return jnp.clip(out, -100.0, 100.0)


def _threshold_inputs(p):
    # Tiny per-feature precompute (plain JAX glue).
    d = p["gamma"].shape[0]
    alpha = jax.nn.sigmoid(p["adaptive_threshold"])                    # (1,)
    thr = alpha * jnp.sqrt(jnp.maximum(p["running_var"], 1e-6))        # (d,)
    return (alpha, p["gamma"].reshape(1, d), p["beta"].reshape(1, d),
            thr.reshape(1, d))


# ---------------------------------------------------------------------------
# Kernel 1: tiled linear (bf16 MXU, f32 accumulation) with fused epilogues
#   epilogue == "none":                y = x @ W + b          (optionally N-tiled)
#   epilogue == "threshold":           y = [gelu](threshold(x @ W + b))
#   epilogue == "threshold_residual":  y = resid + threshold(x @ W + b)
# f32 outputs accumulate directly into the K-resident o_ref block; bf16 outputs
# use an f32 VMEM accumulator scratch.
# ---------------------------------------------------------------------------
def _linear_kernel(*refs, epilogue, apply_gelu, use_scratch, k_axis):
    if use_scratch:
        *refs, acc_ref = refs
        refs = tuple(refs)

    if epilogue == "none":
        x_ref, w_ref, b_ref, o_ref = refs
    elif epilogue == "threshold":
        alpha_ref, x_ref, w_ref, b_ref, g_ref, be_ref, t_ref, o_ref = refs
    else:  # "threshold_residual"
        alpha_ref, x_ref, w_ref, b_ref, g_ref, be_ref, t_ref, r_ref, o_ref = refs

    acc = acc_ref if use_scratch else o_ref
    k = pl.program_id(k_axis)

    @pl.when(k == 0)
    def _():
        acc[...] = jnp.zeros_like(acc)

    acc[...] += jnp.dot(x_ref[...].astype(jnp.bfloat16), w_ref[...],
                        preferred_element_type=jnp.float32)

    @pl.when(k == pl.num_programs(k_axis) - 1)
    def _():
        y = acc[...] + b_ref[...]
        if epilogue != "none":
            y = _apply_threshold(y, alpha_ref[0], g_ref[...], be_ref[...], t_ref[...])
            if apply_gelu:
                y = _gelu_exact(y)
            if epilogue == "threshold_residual":
                y = r_ref[...] + y
        o_ref[...] = y.astype(o_ref.dtype)


def fused_linear(x2d, w_t, b, *, epilogue="none", th=None, resid=None,
                 apply_gelu=False, out_dtype=jnp.float32):
    """x2d: (M, K) f32/bf16;  w_t: (K, N) bf16 pre-transposed;  b: (N,) f32."""
    m, kdim = x2d.shape
    n = w_t.shape[1]

    use_scratch = jnp.dtype(out_dtype) != jnp.dtype(jnp.float32)
    tile_n = (epilogue == "none")        # LayerNorm epilogues need the full feature row
    tk = _choose_tile(kdim, K_TILE)
    tn = _choose_tile(n, N_TILE) if tile_n else n

    x_bytes = jnp.dtype(x2d.dtype).itemsize
    o_bytes = jnp.dtype(out_dtype).itemsize

    def footprint(tm_):
        f = 2 * tm_ * tk * x_bytes          # x blocks (double-buffered)
        f += 2 * tk * tn * 2                # bf16 weight blocks
        f += 2 * tm_ * tn * o_bytes         # output blocks
        if use_scratch:
            f += tm_ * tn * 4               # f32 accumulator
        if resid is not None:
            f += 2 * tm_ * tn * 4           # f32 residual blocks
        f += 8 * n * 4                      # per-feature vectors
        return f

    tm = ROW_TILE
    while tm > 64 and footprint(tm) > _vmem_budget():
        tm //= 2
    if m <= tm:
        tm = m

    pad = (-m) % tm
    if pad:
        x2d = jnp.pad(x2d, ((0, pad), (0, 0)))
        if resid is not None:
            resid = jnp.pad(resid, ((0, pad), (0, 0)))
    mp = m + pad

    if tile_n:
        grid = (mp // tm, n // tn, kdim // tk)
        x_spec = pl.BlockSpec((tm, tk), lambda i, j, k: (i, k))
        w_spec = pl.BlockSpec((tk, tn), lambda i, j, k: (k, j))
        vec_spec = pl.BlockSpec((1, tn), lambda i, j, k: (0, j))
        out_spec = pl.BlockSpec((tm, tn), lambda i, j, k: (i, j))
        row_spec = pl.BlockSpec((tm, tn), lambda i, j, k: (i, j))
        sem = ("parallel", "parallel", "arbitrary")
        k_axis = 2
    else:
        grid = (mp // tm, kdim // tk)
        x_spec = pl.BlockSpec((tm, tk), lambda i, k: (i, k))
        w_spec = pl.BlockSpec((tk, n), lambda i, k: (k, 0))
        vec_spec = pl.BlockSpec((1, n), lambda i, k: (0, 0))
        out_spec = pl.BlockSpec((tm, n), lambda i, k: (i, 0))
        row_spec = pl.BlockSpec((tm, n), lambda i, k: (i, 0))
        sem = ("parallel", "arbitrary")
        k_axis = 1

    args = [x2d, w_t, b.reshape(1, n)]
    in_specs = [x_spec, w_spec, vec_spec]
    if epilogue != "none":
        alpha, gamma, beta, thr = th
        args = [alpha] + args + [gamma, beta, thr]
        in_specs = [_SMEM_SPEC] + in_specs + [vec_spec, vec_spec, vec_spec]
        if epilogue == "threshold_residual":
            args.append(resid)
            in_specs.append(row_spec)

    scratch_shapes = [pltpu.VMEM((tm, tn), jnp.float32)] if use_scratch else []

    out = pl.pallas_call(
        functools.partial(_linear_kernel, epilogue=epilogue, apply_gelu=apply_gelu,
                          use_scratch=use_scratch, k_axis=k_axis),
        grid=grid,
        out_shape=jax.ShapeDtypeStruct((mp, n), out_dtype),
        in_specs=in_specs,
        out_specs=out_spec,
        scratch_shapes=scratch_shapes,
        compiler_params=_cparams(sem),
    )(*args)
    return out[:m] if pad else out


# ---------------------------------------------------------------------------
# Kernel 2: standalone ImprovedEmergentThresholdLayer (row-tiled; used once for
# final_threshold — everywhere else it is fused into the matmul epilogue)
# ---------------------------------------------------------------------------
def _threshold_kernel(alpha_ref, x_ref, g_ref, be_ref, t_ref, o_ref):
    y = _apply_threshold(x_ref[...].astype(jnp.float32), alpha_ref[0],
                         g_ref[...], be_ref[...], t_ref[...])
    o_ref[...] = y.astype(o_ref.dtype)


def threshold_layer(x2d, p, out_dtype=jnp.float32):
    # TODO(synk): training-mode running_mean/running_var momentum updates not
    #             implemented (eval mode: buffers are frozen).
    m, d = x2d.shape
    alpha, gamma, beta, thr = _threshold_inputs(p)

    x_bytes = jnp.dtype(x2d.dtype).itemsize
    o_bytes = jnp.dtype(out_dtype).itemsize
    tm = ROW_TILE
    while tm > 64 and 2 * tm * d * (x_bytes + o_bytes) + 12 * d * 4 > _vmem_budget():
        tm //= 2
    if m <= tm:
        tm = m

    pad = (-m) % tm
    x2 = jnp.pad(x2d, ((0, pad), (0, 0))) if pad else x2d
    mp = m + pad

    vec = pl.BlockSpec((1, d), lambda i: (0, 0))
    out = pl.pallas_call(
        _threshold_kernel,
        grid=(mp // tm,),
        out_shape=jax.ShapeDtypeStruct((mp, d), out_dtype),
        in_specs=[_SMEM_SPEC, pl.BlockSpec((tm, d), lambda i: (i, 0)), vec, vec, vec],
        out_specs=pl.BlockSpec((tm, d), lambda i: (i, 0)),
        compiler_params=_cparams(("parallel",)),
    )(alpha, x2, gamma, beta, thr)
    return out[:m] if pad else out


# ---------------------------------------------------------------------------
# Kernel 3: thresholded causal attention core.
# Grid = (B, T // tq), both "parallel" (v7x megacore friendly). The (T, 3E) QKV
# block's index_map ignores the query-tile axis, so it stays VMEM-resident across
# query tiles. Per-head (tq, T) score planes bound VMEM; per-head outputs are
# stored straight into o_ref column slices (bounded live ranges). attn_scale is
# folded into the Q projection weights, so no in-kernel scaling.
# ---------------------------------------------------------------------------
def _attn_kernel(thr_ref, qkv_ref, o_ref, *, n_heads, head_dim, tq):
    # TODO(synk): flash-style KV tiling (online softmax) for very long T; current
    #             per-head score plane is (tq, T).
    # TODO(synk): training-mode score running-stat updates not implemented (eval).
    e = n_heads * head_dim
    t = qkv_ref.shape[0]

    q0 = pl.multiple_of(pl.program_id(1) * tq, tq)
    rows = q0 + lax.broadcasted_iota(jnp.int32, (tq, 1), 0)
    cols = lax.broadcasted_iota(jnp.int32, (1, t), 1)
    causal = cols > rows                                       # (tq, t) via broadcast

    for h in range(n_heads):
        c0 = h * head_dim
        c1 = c0 + head_dim
        q = qkv_ref[pl.ds(q0, tq), c0:c1]                      # (tq, hd), pre-scaled
        k = qkv_ref[:, e + c0:e + c1]                          # (t,  hd)
        v = qkv_ref[:, 2 * e + c0:2 * e + c1]                  # (t,  hd)

        s = lax.dot_general(q.astype(jnp.bfloat16), k.astype(jnp.bfloat16),
                            (((1,), (1,)), ((), ())),
                            preferred_element_type=jnp.float32)        # (tq, t)
        # masked_fill(causal, -inf) then (~isinf & s < thr) -> -10000, in one pass.
        s = jnp.where(causal, -jnp.inf,
                      jnp.where(s < thr_ref[h], -10000.0, s))

        m = jnp.max(s, axis=-1, keepdims=True)
        p = jnp.exp(s - m)
        p = p * pl.reciprocal(jnp.sum(p, axis=-1, keepdims=True), approx=True)
        o_ref[:, c0:c1] = jnp.dot(p.astype(jnp.bfloat16), v.astype(jnp.bfloat16),
                                  preferred_element_type=jnp.float32
                                  ).astype(o_ref.dtype)


def attention_core(qkv3d, thr_h, n_heads, head_dim):
    B, T, three_e = qkv3d.shape
    E = n_heads * head_dim
    tq = _choose_tile(T, Q_TILE)
    return pl.pallas_call(
        functools.partial(_attn_kernel, n_heads=n_heads, head_dim=head_dim, tq=tq),
        grid=(B, T // tq),
        out_shape=jax.ShapeDtypeStruct((B, T, E), jnp.bfloat16),
        in_specs=[_SMEM_SPEC,
                  pl.BlockSpec((None, T, three_e), lambda b, qi: (b, 0, 0))],
        out_specs=pl.BlockSpec((None, tq, E), lambda b, qi: (b, qi, 0)),
        compiler_params=_cparams(("parallel", "parallel")),
    )(thr_h, qkv3d)


# ---------------------------------------------------------------------------
# Transformer block + full model forward
# ---------------------------------------------------------------------------
def transformer_block(x2, p, n_heads, B, T, E):
    hd = E // n_heads

    # Attention: fused QKV matmul (bf16 out, N-tiled) -> attention core ->
    # out-proj with threshold1 + residual fused (f32 residual stream).
    qkv = fused_linear(x2, p["w_qkv"], p["b_qkv"], out_dtype=jnp.bfloat16)  # (BT, 3E)
    thr_h = (jax.nn.sigmoid(p["score_threshold"]) *
             jnp.sqrt(jnp.maximum(p["score_running_var"], 1e-6)))           # (H,)
    attn = attention_core(qkv.reshape(B, T, 3 * E), thr_h, n_heads, hd)     # (B,T,E) bf16

    x2 = fused_linear(attn.reshape(B * T, E), p["w_o"], p["b_o"],
                      epilogue="threshold_residual",
                      th=_threshold_inputs(p["th1"]), resid=x2)             # x + th1(attn)

    # Feed-forward: Linear1 + th_ff + GELU fused (bf16 hidden); Linear2 + th2 +
    # residual fused (f32 residual stream).
    h = fused_linear(x2, p["ff_w1"], p["ff_b1"], epilogue="threshold",
                     th=_threshold_inputs(p["th_ff"]), apply_gelu=True,
                     out_dtype=jnp.bfloat16)                                # (BT, 4E)
    x2 = fused_linear(h, p["ff_w2"], p["ff_b2"], epilogue="threshold_residual",
                      th=_threshold_inputs(p["th2"]), resid=x2)             # x + th2(ff)
    return x2


def byte_transformer_forward(tokens, params, n_heads):
    B, T = tokens.shape
    tok_emb = params["token_embedding"][tokens]                  # gather (JAX glue)
    pos_emb = params["pos_embedding"][:T][None, :, :]
    x = tok_emb + pos_emb
    E = x.shape[-1]
    x2 = x.reshape(B * T, E)                                     # f32 residual stream
    for blk_p in params["blocks"]:
        x2 = transformer_block(x2, blk_p, n_heads, B, T, E)
    xt = threshold_layer(x2, params["final_threshold"], out_dtype=jnp.bfloat16)
    logits = fused_linear(xt, params["lnf_w"], params["lnf_b"])  # f32 logits
    return logits.reshape(B, T, -1)


# ---------------------------------------------------------------------------
# Deterministic parameter initialization (shapes per module __init__).
# Weights are stored pre-transposed (Din, Dout) in bf16; Q/K/V concatenated along
# the output dim; attn_scale is folded into the Q columns (a PyTorch-checkpoint
# converter would do the same fold on q_proj.weight / q_proj.bias).
# ---------------------------------------------------------------------------
def init_params(key, vocab_size, embed_dim, n_heads, n_layers, block_size):
    keys = iter(jax.random.split(key, 128))

    def dense_f32(din, dout):
        return 0.02 * jax.random.normal(next(keys), (din, dout), jnp.float32)

    def thresh(dim):
        return dict(gamma=jnp.ones((dim,), jnp.float32),
                    beta=jnp.zeros((dim,), jnp.float32),
                    running_var=jnp.ones((dim,), jnp.float32),
                    adaptive_threshold=jnp.full((1,), 0.5, jnp.float32))

    head_dim = embed_dim // n_heads
    attn_scale = 1.0 / math.sqrt(head_dim)
    qkv_col_scale = jnp.concatenate([
        jnp.full((embed_dim,), attn_scale, jnp.float32),
        jnp.ones((2 * embed_dim,), jnp.float32)])                # scale Q columns only

    blocks = []
    for _ in range(n_layers):
        w_qkv = (dense_f32(embed_dim, 3 * embed_dim) * qkv_col_scale).astype(jnp.bfloat16)
        b_qkv = jnp.zeros((3 * embed_dim,), jnp.float32) * qkv_col_scale
        w_o = dense_f32(embed_dim, embed_dim).astype(jnp.bfloat16)
        b_o = jnp.zeros((embed_dim,), jnp.float32)
        w1 = dense_f32(embed_dim, 4 * embed_dim).astype(jnp.bfloat16)
        b1 = jnp.zeros((4 * embed_dim,), jnp.float32)
        w2 = dense_f32(4 * embed_dim, embed_dim).astype(jnp.bfloat16)
        b2 = jnp.zeros((embed_dim,), jnp.float32)
        blocks.append(dict(
            w_qkv=w_qkv, b_qkv=b_qkv, w_o=w_o, b_o=b_o,
            score_threshold=jnp.full((1,), 0.5, jnp.float32),
            score_running_var=jnp.ones((n_heads,), jnp.float32),
            th1=thresh(embed_dim), th2=thresh(embed_dim),
            th_ff=thresh(4 * embed_dim),
            ff_w1=w1, ff_b1=b1, ff_w2=w2, ff_b2=b2))
    lnf_w = dense_f32(embed_dim, vocab_size).astype(jnp.bfloat16)
    lnf_b = jnp.zeros((vocab_size,), jnp.float32)
    return dict(
        token_embedding=0.02 * jax.random.normal(next(keys), (vocab_size, embed_dim),
                                                 jnp.float32),
        pos_embedding=0.02 * jax.random.normal(next(keys), (block_size, embed_dim),
                                               jnp.float32),
        blocks=blocks,
        final_threshold=thresh(embed_dim),
        lnf_w=lnf_w, lnf_b=lnf_b,
    )


if __name__ == "__main__":
    vocab_size, embed_dim, n_heads, n_layers, block_size = 64, 32, 4, 2, 16
    B, T = 2, 8

    key = jax.random.PRNGKey(0)
    pkey, dkey = jax.random.split(key)
    params = init_params(pkey, vocab_size, embed_dim, n_heads, n_layers, block_size)
    tokens = jax.random.randint(dkey, (B, T), 0, vocab_size, dtype=jnp.int32)

    fwd = jax.jit(functools.partial(byte_transformer_forward, n_heads=n_heads))
    logits = fwd(tokens, params)
    jax.block_until_ready(logits)

    assert logits.shape == (B, T, vocab_size)
    assert bool(jnp.all(jnp.isfinite(logits)))
    print("KERNEL_OK")
</pallas_src>

<mosaic_0001>
module attributes {stable_mosaic.version = 11 : i64} {
  func.func @_linear_kernel(%arg0: i32, %arg1: i32, %arg2: memref<1xf32, #tpu.memory_space<smem>>, %arg3: memref<16x32xbf16, #tpu.memory_space<vmem>>, %arg4: memref<32x32xbf16, #tpu.memory_space<vmem>>, %arg5: memref<1x32xf32, #tpu.memory_space<vmem>>, %arg6: memref<1x32xf32, #tpu.memory_space<vmem>>, %arg7: memref<1x32xf32, #tpu.memory_space<vmem>>, %arg8: memref<1x32xf32, #tpu.memory_space<vmem>>, %arg9: memref<16x32xf32, #tpu.memory_space<vmem>>, %arg10: memref<16x32xf32, #tpu.memory_space<vmem>>) attributes {dimension_semantics = [#tpu.dimension_semantics<parallel>, #tpu.dimension_semantics<arbitrary>], iteration_bounds = array<i64: 1, 1>, scalar_prefetch = 0 : i64, scratch_operands = 0 : i64, tpu.core_type = #tpu.core_type<tc>, window_params = [{transform_indices = @transform_0, window_bounds = array<i64: 1>}, {transform_indices = @transform_1, window_bounds = array<i64: 16, 32>}, {transform_indices = @transform_2, window_bounds = array<i64: 32, 32>}, {pipeline_mode = #tpu.pipeline_mode<synchronous>, transform_indices = @transform_3, window_bounds = array<i64: 1, 32>}, {pipeline_mode = #tpu.pipeline_mode<synchronous>, transform_indices = @transform_4, window_bounds = array<i64: 1, 32>}, {pipeline_mode = #tpu.pipeline_mode<synchronous>, transform_indices = @transform_5, window_bounds = array<i64: 1, 32>}, {pipeline_mode = #tpu.pipeline_mode<synchronous>, transform_indices = @transform_6, window_bounds = array<i64: 1, 32>}, {transform_indices = @transform_7, window_bounds = array<i64: 16, 32>}, {transform_indices = @transform_8, window_bounds = array<i64: 16, 32>}]} {
    %c0_i32 = arith.constant 0 : i32
    %0 = arith.cmpi eq, %arg1, %c0_i32 : i32
    %1 = arith.extui %0 : i1 to i32
    %c0_i32_0 = arith.constant 0 : i32
    %2 = arith.cmpi ne, %1, %c0_i32_0 : i32
    scf.if %2 {
      %cst_10 = arith.constant 0.000000e+00 : f32
      %12 = vector.broadcast %cst_10 : f32 to vector<16x32xf32>
      %c0_11 = arith.constant 0 : index
      %c0_12 = arith.constant 0 : index
      %13 = vector.load %arg10[%c0_11, %c0_12] : memref<16x32xf32, #tpu.memory_space<vmem>>, vector<16x32xf32>
      tpu.vector_store %arg10[%c0_11, %c0_12], %12 {strides = array<i32>} : memref<16x32xf32, #tpu.memory_space<vmem>>, vector<16x32xf32>,
    } else {
    }
    %c0 = arith.constant 0 : index
    %c0_1 = arith.constant 0 : index
    %3 = vector.load %arg10[%c0, %c0_1] : memref<16x32xf32, #tpu.memory_space<vmem>>, vector<16x32xf32>
    %c0_2 = arith.constant 0 : index
    %c0_3 = arith.constant 0 : index
    %4 = vector.load %arg3[%c0_2, %c0_3] : memref<16x32xbf16, #tpu.memory_space<vmem>>, vector<16x32xbf16>
    %c0_4 = arith.constant 0 : index
    %c0_5 = arith.constant 0 : index
    %5 = vector.load %arg4[%c0_4, %c0_5] : memref<32x32xbf16, #tpu.memory_space<vmem>>, vector<32x32xbf16>
    %cst = arith.constant dense<0.000000e+00> : vector<16x32xf32>
    %6 = tpu.matmul %4, %5, %cst {dimension_numbers = #tpu.dot_dimension_numbers<[1], [0], [0], [1], [0, 0, 1, 1], [], []>} : vector<16x32xbf16>, vector<32x32xbf16>, vector<16x32xf32> -> vector<16x32xf32>
    %7 = arith.addf %3, %6 : vector<16x32xf32>
    %c0_6 = arith.constant 0 : index
    %c0_7 = arith.constant 0 : index
    %8 = vector.load %arg10[%c0_6, %c0_7] : memref<16x32xf32, #tpu.memory_space<vmem>>, vector<16x32xf32>
    tpu.vector_store %arg10[%c0_6, %c0_7], %7 {strides = array<i32>} : memref<16x32xf32, #tpu.memory_space<vmem>>, vector<16x32xf32>,
    %c0_i32_8 = arith.constant 0 : i32
    %9 = arith.cmpi eq, %arg1, %c0_i32_8 : i32
    %10 = arith.extui %9 : i1 to i32
    %c0_i32_9 = arith.constant 0 : i32
    %11 = arith.cmpi ne, %10, %c0_i32_9 : i32
    scf.if %11 {
      %c0_10 = arith.constant 0 : index
      %c0_11 = arith.constant 0 : index
      %12 = vector.load %arg10[%c0_10, %c0_11] : memref<16x32xf32, #tpu.memory_space<vmem>>, vector<16x32xf32>
      %c0_12 = arith.constant 0 : index
      %c0_13 = arith.constant 0 : index
      %13 = vector.load %arg5[%c0_12, %c0_13] : memref<1x32xf32, #tpu.memory_space<vmem>>, vector<1x32xf32>
      %14 = vector.broadcast %13 : vector<1x32xf32> to vector<16x32xf32>
      %15 = arith.addf %12, %14 : vector<16x32xf32>
      %c0_14 = arith.constant 0 : index
      %16 = memref.load %arg2[%c0_14] : memref<1xf32, #tpu.memory_space<smem>>
      %c0_15 = arith.constant 0 : index
      %c0_16 = arith.constant 0 : index
      %17 = vector.load %arg6[%c0_15, %c0_16] : memref<1x32xf32, #tpu.memory_space<vmem>>, vector<1x32xf32>
      %c0_17 = arith.constant 0 : index
      %c0_18 = arith.constant 0 : index
      %18 = vector.load %arg7[%c0_17, %c0_18] : memref<1x32xf32, #tpu.memory_space<vmem>>, vector<1x32xf32>
      %c0_19 = arith.constant 0 : index
      %c0_20 = arith.constant 0 : index
      %19 = vector.load %arg8[%c0_19, %c0_20] : memref<1x32xf32, #tpu.memory_space<vmem>>, vector<1x32xf32>
      %cst_21 = arith.constant dense<0.000000e+00> : vector<16xf32>
      %20 = vector.multi_reduction <add>, %15, %cst_21 [1] : vector<16x32xf32> to vector<16xf32>
      %21 = vector.shape_cast %20 : vector<16xf32> to vector<16x1xf32>
      %cst_22 = arith.constant 3.200000e+01 : f32
      %22 = vector.broadcast %cst_22 : f32 to vector<16x1xf32>
      %23 = arith.divf %21, %22 : vector<16x1xf32>
      %24 = vector.broadcast %23 : vector<16x1xf32> to vector<16x32xf32>
      %25 = arith.subf %15, %24 : vector<16x32xf32>
      %26 = arith.mulf %25, %25 : vector<16x32xf32>
      %cst_23 = arith.constant dense<0.000000e+00> : vector<16xf32>
      %27 = vector.multi_reduction <add>, %26, %cst_23 [1] : vector<16x32xf32> to vector<16xf32>
      %28 = vector.shape_cast %27 : vector<16xf32> to vector<16x1xf32>
      %cst_24 = arith.constant 3.200000e+01 : f32
      %29 = vector.broadcast %cst_24 : f32 to vector<16x1xf32>
      %30 = arith.divf %28, %29 : vector<16x1xf32>
      %31 = vector.broadcast %23 : vector<16x1xf32> to vector<16x32xf32>
      %32 = arith.subf %15, %31 : vector<16x32xf32>
      %cst_25 = arith.constant 9.99999974E-6 : f32
      %33 = vector.broadcast %cst_25 : f32 to vector<16x1xf32>
      %34 = arith.addf %30, %33 : vector<16x1xf32>
      %35 = math.rsqrt %34 : vector<16x1xf32>
      %36 = vector.broadcast %35 : vector<16x1xf32> to vector<16x32xf32>
      %37 = arith.mulf %32, %36 : vector<16x32xf32>
      %38 = vector.broadcast %17 : vector<1x32xf32> to vector<16x32xf32>
      %39 = arith.mulf %37, %38 : vector<16x32xf32>
      %40 = vector.broadcast %18 : vector<1x32xf32> to vector<16x32xf32>
      %41 = arith.addf %39, %40 : vector<16x32xf32>
      %42 = math.absf %41 : vector<16x32xf32>
      %43 = vector.broadcast %19 : vector<1x32xf32> to vector<16x32xf32>
      %44 = arith.subf %42, %43 : vector<16x32xf32>
      %45 = arith.negf %44 : vector<16x32xf32>
      %46 = math.exp %45 : vector<16x32xf32>
      %cst_26 = arith.constant 1.000000e+00 : f32
      %47 = vector.broadcast %cst_26 : f32 to vector<16x32xf32>
      %48 = arith.addf %47, %46 : vector<16x32xf32>
      %49 = arith.divf %47, %48 : vector<16x32xf32>
      %50 = arith.mulf %49, %15 : vector<16x32xf32>
      %51 = vector.broadcast %16 : f32 to vector<16x32xf32>
      %52 = arith.mulf %51, %50 : vector<16x32xf32>
      %cst_27 = arith.constant 1.000000e+00 : f32
      %53 = arith.subf %cst_27, %16 : f32
      %54 = vector.broadcast %53 : f32 to vector<16x32xf32>
      %55 = arith.mulf %54, %15 : vector<16x32xf32>
      %56 = arith.addf %52, %55 : vector<16x32xf32>
      %cst_28 = arith.constant -1.000000e+02 : f32
      %cst_29 = arith.constant 1.000000e+02 : f32
      %57 = vector.broadcast %cst_28 : f32 to vector<16x32xf32>
      %58 = arith.maximumf %57, %56 : vector<16x32xf32>
      %59 = vector.broadcast %cst_29 : f32 to vector<16x32xf32>
      %60 = arith.minimumf %59, %58 : vector<16x32xf32>
      %c0_30 = arith.constant 0 : index
      %c0_31 = arith.constant 0 : index
      %61 = vector.load %arg9[%c0_30, %c0_31] : memref<16x32xf32, #tpu.memory_space<vmem>>, vector<16x32xf32>
      %62 = arith.addf %61, %60 : vector<16x32xf32>
      %c0_32 = arith.constant 0 : index
      %c0_33 = arith.constant 0 : index
      %63 = vector.load %arg10[%c0_32, %c0_33] : memref<16x32xf32, #tpu.memory_space<vmem>>, vector<16x32xf32>
      tpu.vector_store %arg10[%c0_32, %c0_33], %62 {strides = array<i32>} : memref<16x32xf32, #tpu.memory_space<vmem>>, vector<16x32xf32>,
    } else {
    }
    return
  }
  func.func @transform_0(%arg0: i32, %arg1: i32) -> i32 {
    %c0_i32 = arith.constant 0 : i32
    %c0_i32_0 = arith.constant 0 : i32
    return %c0_i32 : i32
  }
  func.func @transform_1(%arg0: i32, %arg1: i32) -> (i32, i32) {
    %c0_i32 = arith.constant 0 : i32
    return %arg0, %arg1 : i32, i32
  }
  func.func @transform_2(%arg0: i32, %arg1: i32) -> (i32, i32) {
    %c0_i32 = arith.constant 0 : i32
    %c0_i32_0 = arith.constant 0 : i32
    return %arg1, %c0_i32 : i32, i32
  }
  func.func @transform_3(%arg0: i32, %arg1: i32) -> (i32, i32) {
    %c0_i32 = arith.constant 0 : i32
    %c0_i32_0 = arith.constant 0 : i32
    %c0_i32_1 = arith.constant 0 : i32
    return %c0_i32, %c0_i32_0 : i32, i32
  }
  func.func @transform_4(%arg0: i32, %arg1: i32) -> (i32, i32) {
    %c0_i32 = arith.constant 0 : i32
    %c0_i32_0 = arith.constant 0 : i32
    %c0_i32_1 = arith.constant 0 : i32
    return %c0_i32, %c0_i32_0 : i32, i32
  }
  func.func @transform_5(%arg0: i32, %arg1: i32) -> (i32, i32) {
    %c0_i32 = arith.constant 0 : i32
    %c0_i32_0 = arith.constant 0 : i32
    %c0_i32_1 = arith.constant 0 : i32
    return %c0_i32, %c0_i32_0 : i32, i32
  }
  func.func @transform_6(%arg0: i32, %arg1: i32) -> (i32, i32) {
    %c0_i32 = arith.constant 0 : i32
    %c0_i32_0 = arith.constant 0 : i32
    %c0_i32_1 = arith.constant 0 : i32
    return %c0_i32, %c0_i32_0 : i32, i32
  }
  func.func @transform_7(%arg0: i32, %arg1: i32) -> (i32, i32) {
    %c0_i32 = arith.constant 0 : i32
    %c0_i32_0 = arith.constant 0 : i32
    return %arg0, %c0_i32 : i32, i32
  }
  func.func @transform_8(%arg0: i32, %arg1: i32) -> (i32, i32) {
    %c0_i32 = arith.constant 0 : i32
    %c0_i32_0 = arith.constant 0 : i32
    return %arg0, %c0_i32 : i32, i32
  }
}

module attributes {stable_mosaic.version = 11 : i64} {
  func.func @_attn_kernel(%arg0: i32, %arg1: i32, %arg2: memref<4xf32, #tpu.memory_space<smem>>, %arg3: memref<1x8x96xbf16, #tpu.memory_space<vmem>>, %arg4: memref<1x8x32xbf16, #tpu.memory_space<vmem>>) attributes {dimension_semantics = [#tpu.dimension_semantics<parallel>, #tpu.dimension_semantics<parallel>], iteration_bounds = array<i64: 2, 1>, scalar_prefetch = 0 : i64, scratch_operands = 0 : i64, tpu.core_type = #tpu.core_type<tc>, window_params = [{transform_indices = @transform_0, window_bounds = array<i64: 4>}, {transform_indices = @transform_1, window_bounds = array<i64: 1, 8, 96>}, {transform_indices = @transform_2, window_bounds = array<i64: 1, 8, 32>}]} {
    %c8_i32 = arith.constant 8 : i32
    %0 = arith.muli %arg1, %c8_i32 : i32
    %1 = tpu.assume_multiple %0, 8 : i32
    %2 = tpu.iota {dimensions = array<i32: 0>} : vector<8x1xi32>
    %3 = vector.broadcast %1 : i32 to vector<8x1xi32>
    %4 = arith.addi %3, %2 : vector<8x1xi32>
    %5 = tpu.iota {dimensions = array<i32: 1>} : vector<1x8xi32>
    %6 = vector.broadcast %5 : vector<1x8xi32> to vector<8x8xi32>
    %7 = vector.broadcast %4 : vector<8x1xi32> to vector<8x8xi32>
    %8 = arith.cmpi sgt, %6, %7 : vector<8x8xi32>
    %c0 = arith.constant 0 : index
    %9 = arith.index_cast %1 : i32 to index
    %c0_0 = arith.constant 0 : index
    %10 = vector.load %arg3[%c0, %9, %c0_0] : memref<1x8x96xbf16, #tpu.memory_space<vmem>>, vector<1x8x8xbf16>
    %11 = vector.shape_cast %10 : vector<1x8x8xbf16> to vector<8x8xbf16>
    %c0_1 = arith.constant 0 : index
    %c0_2 = arith.constant 0 : index
    %c32 = arith.constant 32 : index
    %12 = vector.load %arg3[%c0_1, %c0_2, %c32] : memref<1x8x96xbf16, #tpu.memory_space<vmem>>, vector<1x8x8xbf16>
    %13 = vector.shape_cast %12 : vector<1x8x8xbf16> to vector<8x8xbf16>
    %c0_3 = arith.constant 0 : index
    %c0_4 = arith.constant 0 : index
    %c64 = arith.constant 64 : index
    %14 = vector.load %arg3[%c0_3, %c0_4, %c64] : memref<1x8x96xbf16, #tpu.memory_space<vmem>>, vector<1x8x8xbf16>
    %15 = vector.shape_cast %14 : vector<1x8x8xbf16> to vector<8x8xbf16>
    %cst = arith.constant dense<0.000000e+00> : vector<8x8xf32>
    %16 = tpu.matmul %11, %13, %cst {dimension_numbers = #tpu.dot_dimension_numbers<[1], [1], [0], [0], [0, 0, 1, 0], [], []>} : vector<8x8xbf16>, vector<8x8xbf16>, vector<8x8xf32> -> vector<8x8xf32>
    %c0_5 = arith.constant 0 : index
    %17 = memref.load %arg2[%c0_5] : memref<4xf32, #tpu.memory_space<smem>>
    %18 = vector.broadcast %17 : f32 to vector<8x8xf32>
    %19 = arith.cmpf olt, %16, %18 : vector<8x8xf32>
    %cst_6 = arith.constant -1.000000e+04 : f32
    %20 = vector.broadcast %cst_6 : f32 to vector<8x8xf32>
    %21 = arith.select %19, %20, %16 : vector<8x8xi1>, vector<8x8xf32>
    %cst_7 = arith.constant 0xFF800000 : f32
    %22 = vector.broadcast %cst_7 : f32 to vector<8x8xf32>
    %23 = arith.select %8, %22, %21 : vector<8x8xi1>, vector<8x8xf32>
    %cst_8 = arith.constant dense<0xFF800000> : vector<8xf32>
    %24 = vector.multi_reduction <maximumf>, %23, %cst_8 [1] : vector<8x8xf32> to vector<8xf32>
    %25 = vector.shape_cast %24 : vector<8xf32> to vector<8x1xf32>
    %26 = vector.broadcast %25 : vector<8x1xf32> to vector<8x8xf32>
    %27 = arith.subf %23, %26 : vector<8x8xf32>
    %28 = math.exp %27 : vector<8x8xf32>
    %cst_9 = arith.constant dense<0.000000e+00> : vector<8xf32>
    %29 = vector.multi_reduction <add>, %28, %cst_9 [1] : vector<8x8xf32> to vector<8xf32>
    %30 = vector.shape_cast %29 : vector<8xf32> to vector<8x1xf32>
    %31 = tpu.reciprocal %30 {approx = true} : vector<8x1xf32> -> vector<8x1xf32>
    %32 = vector.broadcast %31 : vector<8x1xf32> to vector<8x8xf32>
    %33 = arith.mulf %28, %32 : vector<8x8xf32>
    %34 = arith.truncf %33 : vector<8x8xf32> to vector<8x8xbf16>
    %cst_10 = arith.constant dense<0.000000e+00> : vector<8x8xf32>
    %35 = tpu.matmul %34, %15, %cst_10 {dimension_numbers = #tpu.dot_dimension_numbers<[1], [0], [0], [1], [0, 0, 1, 1], [], []>} : vector<8x8xbf16>, vector<8x8xbf16>, vector<8x8xf32> -> vector<8x8xf32>
    %36 = arith.truncf %35 : vector<8x8xf32> to vector<8x8xbf16>
    %c0_11 = arith.constant 0 : index
    %c0_12 = arith.constant 0 : index
    %c0_13 = arith.constant 0 : index
    %37 = vector.load %arg4[%c0_11, %c0_12, %c0_13] : memref<1x8x32xbf16, #tpu.memory_space<vmem>>, vector<1x8x8xbf16>
    %38 = vector.shape_cast %37 : vector<1x8x8xbf16> to vector<8x8xbf16>
    %39 = vector.shape_cast %36 : vector<8x8xbf16> to vector<1x8x8xbf16>
    tpu.vector_store %arg4[%c0_11, %c0_12, %c0_13], %39 {strides = array<i32>} : memref<1x8x32xbf16, #tpu.memory_space<vmem>>, vector<1x8x8xbf16>,
    %c0_14 = arith.constant 0 : index
    %40 = arith.index_cast %1 : i32 to index
    %c8 = arith.constant 8 : index
    %41 = vector.load %arg3[%c0_14, %40, %c8] : memref<1x8x96xbf16, #tpu.memory_space<vmem>>, vector<1x8x8xbf16>
    %42 = vector.shape_cast %41 : vector<1x8x8xbf16> to vector<8x8xbf16>
    %c0_15 = arith.constant 0 : index
    %c0_16 = arith.constant 0 : index
    %c40 = arith.constant 40 : index
    %43 = vector.load %arg3[%c0_15, %c0_16, %c40] : memref<1x8x96xbf16, #tpu.memory_space<vmem>>, vector<1x8x8xbf16>
    %44 = vector.shape_cast %43 : vector<1x8x8xbf16> to vector<8x8xbf16>
    %c0_17 = arith.constant 0 : index
    %c0_18 = arith.constant 0 : index
    %c72 = arith.constant 72 : index
    %45 = vector.load %arg3[%c0_17, %c0_18, %c72] : memref<1x8x96xbf16, #tpu.memory_space<vmem>>, vector<1x8x8xbf16>
    %46 = vector.shape_cast %45 : vector<1x8x8xbf16> to vector<8x8xbf16>
    %cst_19 = arith.constant dense<0.000000e+00> : vector<8x8xf32>
    %47 = tpu.matmul %42, %44, %cst_19 {dimension_numbers = #tpu.dot_dimension_numbers<[1], [1], [0], [0], [0, 0, 1, 0], [], []>} : vector<8x8xbf16>, vector<8x8xbf16>, vector<8x8xf32> -> vector<8x8xf32>
    %c1 = arith.constant 1 : index
    %48 = memref.load %arg2[%c1] : memref<4xf32, #tpu.memory_space<smem>>
    %49 = vector.broadcast %48 : f32 to vector<8x8xf32>
    %50 = arith.cmpf olt, %47, %49 : vector<8x8xf32>
    %cst_20 = arith.constant -1.000000e+04 : f32
    %51 = vector.broadcast %cst_20 : f32 to vector<8x8xf32>
    %52 = arith.select %50, %51, %47 : vector<8x8xi1>, vector<8x8xf32>
    %cst_21 = arith.constant 0xFF800000 : f32
    %53 = vector.broadcast %cst_21 : f32 to vector<8x8xf32>
    %54 = arith.select %8, %53, %52 : vector<8x8xi1>, vector<8x8xf32>
    %cst_22 = arith.constant dense<0xFF800000> : vector<8xf32>
    %55 = vector.multi_reduction <maximumf>, %54, %cst_22 [1] : vector<8x8xf32> to vector<8xf32>
    %56 = vector.shape_cast %55 : vector<8xf32> to vector<8x1xf32>
    %57 = vector.broadcast %56 : vector<8x1xf32> to vector<8x8xf32>
    %58 = arith.subf %54, %57 : vector<8x8xf32>
    %59 = math.exp %58 : vector<8x8xf32>
    %cst_23 = arith.constant dense<0.000000e+00> : vector<8xf32>
    %60 = vector.multi_reduction <add>, %59, %cst_23 [1] : vector<8x8xf32> to vector<8xf32>
    %61 = vector.shape_cast %60 : vector<8xf32> to vector<8x1xf32>
    %62 = tpu.reciprocal %61 {approx = true} : vector<8x1xf32> -> vector<8x1xf32>
    %63 = vector.broadcast %62 : vector<8x1xf32> to vector<8x8xf32>
    %64 = arith.mulf %59, %63 : vector<8x8xf32>
    %65 = arith.truncf %64 : vector<8x8xf32> to vector<8x8xbf16>
    %cst_24 = arith.constant dense<0.000000e+00> : vector<8x8xf32>
    %66 = tpu.matmul %65, %46, %cst_24 {dimension_numbers = #tpu.dot_dimension_numbers<[1], [0], [0], [1], [0, 0, 1, 1], [], []>} : vector<8x8xbf16>, vector<8x8xbf16>, vector<8x8xf32> -> vector<8x8xf32>
    %67 = arith.truncf %66 : vector<8x8xf32> to vector<8x8xbf16>
    %c0_25 = arith.constant 0 : index
    %c0_26 = arith.constant 0 : index
    %c8_27 = arith.constant 8 : index
    %68 = vector.load %arg4[%c0_25, %c0_26, %c8_27] : memref<1x8x32xbf16, #tpu.memory_space<vmem>>, vector<1x8x8xbf16>
    %69 = vector.shape_cast %68 : vector<1x8x8xbf16> to vector<8x8xbf16>
    %70 = vector.shape_cast %67 : vector<8x8xbf16> to vector<1x8x8xbf16>
    tpu.vector_store %arg4[%c0_25, %c0_26, %c8_27], %70 {strides = array<i32>} : memref<1x8x32xbf16, #tpu.memory_space<vmem>>, vector<1x8x8xbf16>,
    %c0_28 = arith.constant 0 : index
    %71 = arith.index_cast %1 : i32 to index
    %c16 = arith.constant 16 : index
    %72 = vector.load %arg3[%c0_28, %71, %c16] : memref<1x8x96xbf16, #tpu.memory_space<vmem>>, vector<1x8x8xbf16>
    %73 = vector.shape_cast %72 : vector<1x8x8xbf16> to vector<8x8xbf16>
    %c0_29 = arith.constant 0 : index
    %c0_30 = arith.constant 0 : index
    %c48 = arith.constant 48 : index
    %74 = vector.load %arg3[%c0_29, %c0_30, %c48] : memref<1x8x96xbf16, #tpu.memory_space<vmem>>, vector<1x8x8xbf16>
    %75 = vector.shape_cast %74 : vector<1x8x8xbf16> to vector<8x8xbf16>
    %c0_31 = arith.constant 0 : index
    %c0_32 = arith.constant 0 : index
    %c80 = arith.constant 80 : index
    %76 = vector.load %arg3[%c0_31, %c0_32, %c80] : memref<1x8x96xbf16, #tpu.memory_space<vmem>>, vector<1x8x8xbf16>
    %77 = vector.shape_cast %76 : vector<1x8x8xbf16> to vector<8x8xbf16>
    %cst_33 = arith.constant dense<0.000000e+00> : vector<8x8xf32>
    %78 = tpu.matmul %73, %75, %cst_33 {dimension_numbers = #tpu.dot_dimension_numbers<[1], [1], [0], [0], [0, 0, 1, 0], [], []>} : vector<8x8xbf16>, vector<8x8xbf16>, vector<8x8xf32> -> vector<8x8xf32>
    %c2 = arith.constant 2 : index
    %79 = memref.load %arg2[%c2] : memref<4xf32, #tpu.memory_space<smem>>
    %80 = vector.broadcast %79 : f32 to vector<8x8xf32>
    %81 = arith.cmpf olt, %78, %80 : vector<8x8xf32>
    %cst_34 = arith.constant -1.000000e+04 : f32
    %82 = vector.broadcast %cst_34 : f32 to vector<8x8xf32>
    %83 = arith.select %81, %82, %78 : vector<8x8xi1>, vector<8x8xf32>
    %cst_35 = arith.constant 0xFF800000 : f32
    %84 = vector.broadcast %cst_35 : f32 to vector<8x8xf32>
    %85 = arith.select %8, %84, %83 : vector<8x8xi1>, vector<8x8xf32>
    %cst_36 = arith.constant dense<0xFF800000> : vector<8xf32>
    %86 = vector.multi_reduction <maximumf>, %85, %cst_36 [1] : vector<8x8xf32> to vector<8xf32>
    %87 = vector.shape_cast %86 : vector<8xf32> to vector<8x1xf32>
    %88 = vector.broadcast %87 : vector<8x1xf32> to vector<8x8xf32>
    %89 = arith.subf %85, %88 : vector<8x8xf32>
    %90 = math.exp %89 : vector<8x8xf32>
    %cst_37 = arith.constant dense<0.000000e+00> : vector<8xf32>
    %91 = vector.multi_reduction <add>, %90, %cst_37 [1] : vector<8x8xf32> to vector<8xf32>
    %92 = vector.shape_cast %91 : vector<8xf32> to vector<8x1xf32>
    %93 = tpu.reciprocal %92 {approx = true} : vector<8x1xf32> -> vector<8x1xf32>
    %94 = vector.broadcast %93 : vector<8x1xf32> to vector<8x8xf32>
    %95 = arith.mulf %90, %94 : vector<8x8xf32>
    %96 = arith.truncf %95 : vector<8x8xf32> to vector<8x8xbf16>
    %cst_38 = arith.constant dense<0.000000e+00> : vector<8x8xf32>
    %97 = tpu.matmul %96, %77, %cst_38 {dimension_numbers = #tpu.dot_dimension_numbers<[1], [0], [0], [1], [0, 0, 1, 1], [], []>} : vector<8x8xbf16>, vector<8x8xbf16>, vector<8x8xf32> -> vector<8x8xf32>
    %98 = arith.truncf %97 : vector<8x8xf32> to vector<8x8xbf16>
    %c0_39 = arith.constant 0 : index
    %c0_40 = arith.constant 0 : index
    %c16_41 = arith.constant 16 : index
    %99 = vector.load %arg4[%c0_39, %c0_40, %c16_41] : memref<1x8x32xbf16, #tpu.memory_space<vmem>>, vector<1x8x8xbf16>
    %100 = vector.shape_cast %99 : vector<1x8x8xbf16> to vector<8x8xbf16>
    %101 = vector.shape_cast %98 : vector<8x8xbf16> to vector<1x8x8xbf16>
    tpu.vector_store %arg4[%c0_39, %c0_40, %c16_41], %101 {strides = array<i32>} : memref<1x8x32xbf16, #tpu.memory_space<vmem>>, vector<1x8x8xbf16>,
    %c0_42 = arith.constant 0 : index
    %102 = arith.index_cast %1 : i32 to index
    %c24 = arith.constant 24 : index
    %103 = vector.load %arg3[%c0_42, %102, %c24] : memref<1x8x96xbf16, #tpu.memory_space<vmem>>, vector<1x8x8xbf16>
    %104 = vector.shape_cast %103 : vector<1x8x8xbf16> to vector<8x8xbf16>
    %c0_43 = arith.constant 0 : index
    %c0_44 = arith.constant 0 : index
    %c56 = arith.constant 56 : index
    %105 = vector.load %arg3[%c0_43, %c0_44, %c56] : memref<1x8x96xbf16, #tpu.memory_space<vmem>>, vector<1x8x8xbf16>
    %106 = vector.shape_cast %105 : vector<1x8x8xbf16> to vector<8x8xbf16>
    %c0_45 = arith.constant 0 : index
    %c0_46 = arith.constant 0 : index
    %c88 = arith.constant 88 : index
    %107 = vector.load %arg3[%c0_45, %c0_46, %c88] : memref<1x8x96xbf16, #tpu.memory_space<vmem>>, vector<1x8x8xbf16>
    %108 = vector.shape_cast %107 : vector<1x8x8xbf16> to vector<8x8xbf16>
    %cst_47 = arith.constant dense<0.000000e+00> : vector<8x8xf32>
    %109 = tpu.matmul %104, %106, %cst_47 {dimension_numbers = #tpu.dot_dimension_numbers<[1], [1], [0], [0], [0, 0, 1, 0], [], []>} : vector<8x8xbf16>, vector<8x8xbf16>, vector<8x8xf32> -> vector<8x8xf32>
    %c3 = arith.constant 3 : index
    %110 = memref.load %arg2[%c3] : memref<4xf32, #tpu.memory_space<smem>>
    %111 = vector.broadcast %110 : f32 to vector<8x8xf32>
    %112 = arith.cmpf olt, %109, %111 : vector<8x8xf32>
    %cst_48 = arith.constant -1.000000e+04 : f32
    %113 = vector.broadcast %cst_48 : f32 to vector<8x8xf32>
    %114 = arith.select %112, %113, %109 : vector<8x8xi1>, vector<8x8xf32>
    %cst_49 = arith.constant 0xFF800000 : f32
    %115 = vector.broadcast %cst_49 : f32 to vector<8x8xf32>
    %116 = arith.select %8, %115, %114 : vector<8x8xi1>, vector<8x8xf32>
    %cst_50 = arith.constant dense<0xFF800000> : vector<8xf32>
    %117 = vector.multi_reduction <maximumf>, %116, %cst_50 [1] : vector<8x8xf32> to vector<8xf32>
    %118 = vector.shape_cast %117 : vector<8xf32> to vector<8x1xf32>
    %119 = vector.broadcast %118 : vector<8x1xf32> to vector<8x8xf32>
    %120 = arith.subf %116, %119 : vector<8x8xf32>
    %121 = math.exp %120 : vector<8x8xf32>
    %cst_51 = arith.constant dense<0.000000e+00> : vector<8xf32>
    %122 = vector.multi_reduction <add>, %121, %cst_51 [1] : vector<8x8xf32> to vector<8xf32>
    %123 = vector.shape_cast %122 : vector<8xf32> to vector<8x1xf32>
    %124 = tpu.reciprocal %123 {approx = true} : vector<8x1xf32> -> vector<8x1xf32>
    %125 = vector.broadcast %124 : vector<8x1xf32> to vector<8x8xf32>
    %126 = arith.mulf %121, %125 : vector<8x8xf32>
    %127 = arith.truncf %126 : vector<8x8xf32> to vector<8x8xbf16>
    %cst_52 = arith.constant dense<0.000000e+00> : vector<8x8xf32>
    %128 = tpu.matmul %127, %108, %cst_52 {dimension_numbers = #tpu.dot_dimension_numbers<[1], [0], [0], [1], [0, 0, 1, 1], [], []>} : vector<8x8xbf16>, vector<8x8xbf16>, vector<8x8xf32> -> vector<8x8xf32>
    %129 = arith.truncf %128 : vector<8x8xf32> to vector<8x8xbf16>
    %c0_53 = arith.constant 0 : index
    %c0_54 = arith.constant 0 : index
    %c24_55 = arith.constant 24 : index
    %130 = vector.load %arg4[%c0_53, %c0_54, %c24_55] : memref<1x8x32xbf16, #tpu.memory_space<vmem>>, vector<1x8x8xbf16>
    %131 = vector.shape_cast %130 : vector<1x8x8xbf16> to vector<8x8xbf16>
    %132 = vector.shape_cast %129 : vector<8x8xbf16> to vector<1x8x8xbf16>
    tpu.vector_store %arg4[%c0_53, %c0_54, %c24_55], %132 {strides = array<i32>} : memref<1x8x32xbf16, #tpu.memory_space<vmem>>, vector<1x8x8xbf16>,
    return
  }
  func.func @transform_0(%arg0: i32, %arg1: i32) -> i32 {
    %c0_i32 = arith.constant 0 : i32
    %c0_i32_0 = arith.constant 0 : i32
    return %c0_i32 : i32
  }
  func.func @transform_1(%arg0: i32, %arg1: i32) -> (i32, i32, i32) {
    %c0_i32 = arith.constant 0 : i32
    %c0_i32_0 = arith.constant 0 : i32
    %c0_i32_1 = arith.constant 0 : i32
    return %arg0, %c0_i32, %c0_i32_0 : i32, i32, i32
  }
  func.func @transform_2(%arg0: i32, %arg1: i32) -> (i32, i32, i32) {
    %c0_i32 = arith.constant 0 : i32
    %c0_i32_0 = arith.constant 0 : i32
    return %arg0, %arg1, %c0_i32 : i32, i32, i32
  }
}

module attributes {stable_mosaic.version = 11 : i64} {
  func.func @_linear_kernel(%arg0: i32, %arg1: i32, %arg2: i32, %arg3: memref<16x32xf32, #tpu.memory_space<vmem>>, %arg4: memref<32x96xbf16, #tpu.memory_space<vmem>>, %arg5: memref<1x96xf32, #tpu.memory_space<vmem>>, %arg6: memref<16x96xbf16, #tpu.memory_space<vmem>>, %arg7: memref<16x96xf32, #tpu.memory_space<vmem>>) attributes {dimension_semantics = [#tpu.dimension_semantics<parallel>, #tpu.dimension_semantics<parallel>, #tpu.dimension_semantics<arbitrary>], iteration_bounds = array<i64: 1, 1, 1>, scalar_prefetch = 0 : i64, scratch_operands = 1 : i64, tpu.core_type = #tpu.core_type<tc>, window_params = [{transform_indices = @transform_0, window_bounds = array<i64: 16, 32>}, {transform_indices = @transform_1, window_bounds = array<i64: 32, 96>}, {transform_indices = @transform_2, window_bounds = array<i64: 1, 96>}, {transform_indices = @transform_3, window_bounds = array<i64: 16, 96>}]} {
    %c0_i32 = arith.constant 0 : i32
    %0 = arith.cmpi eq, %arg2, %c0_i32 : i32
    %1 = arith.extui %0 : i1 to i32
    %c0_i32_0 = arith.constant 0 : i32
    %2 = arith.cmpi ne, %1, %c0_i32_0 : i32
    scf.if %2 {
      %cst_10 = arith.constant 0.000000e+00 : f32
      %13 = vector.broadcast %cst_10 : f32 to vector<16x96xf32>
      %c0_11 = arith.constant 0 : index
      %c0_12 = arith.constant 0 : index
      %14 = vector.load %arg7[%c0_11, %c0_12] : memref<16x96xf32, #tpu.memory_space<vmem>>, vector<16x96xf32>
      tpu.vector_store %arg7[%c0_11, %c0_12], %13 {strides = array<i32>} : memref<16x96xf32, #tpu.memory_space<vmem>>, vector<16x96xf32>,
    } else {
    }
    %c0 = arith.constant 0 : index
    %c0_1 = arith.constant 0 : index
    %3 = vector.load %arg7[%c0, %c0_1] : memref<16x96xf32, #tpu.memory_space<vmem>>, vector<16x96xf32>
    %c0_2 = arith.constant 0 : index
    %c0_3 = arith.constant 0 : index
    %4 = vector.load %arg3[%c0_2, %c0_3] : memref<16x32xf32, #tpu.memory_space<vmem>>, vector<16x32xf32>
    %5 = arith.truncf %4 : vector<16x32xf32> to vector<16x32xbf16>
    %c0_4 = arith.constant 0 : index
    %c0_5 = arith.constant 0 : index
    %6 = vector.load %arg4[%c0_4, %c0_5] : memref<32x96xbf16, #tpu.memory_space<vmem>>, vector<32x96xbf16>
    %cst = arith.constant dense<0.000000e+00> : vector<16x96xf32>
    %7 = tpu.matmul %5, %6, %cst {dimension_numbers = #tpu.dot_dimension_numbers<[1], [0], [0], [1], [0, 0, 1, 1], [], []>} : vector<16x32xbf16>, vector<32x96xbf16>, vector<16x96xf32> -> vector<16x96xf32>
    %8 = arith.addf %3, %7 : vector<16x96xf32>
    %c0_6 = arith.constant 0 : index
    %c0_7 = arith.constant 0 : index
    %9 = vector.load %arg7[%c0_6, %c0_7] : memref<16x96xf32, #tpu.memory_space<vmem>>, vector<16x96xf32>
    tpu.vector_store %arg7[%c0_6, %c0_7], %8 {strides = array<i32>} : memref<16x96xf32, #tpu.memory_space<vmem>>, vector<16x96xf32>,
    %c0_i32_8 = arith.constant 0 : i32
    %10 = arith.cmpi eq, %arg2, %c0_i32_8 : i32
    %11 = arith.extui %10 : i1 to i32
    %c0_i32_9 = arith.constant 0 : i32
    %12 = arith.cmpi ne, %11, %c0_i32_9 : i32
    scf.if %12 {
      %c0_10 = arith.constant 0 : index
      %c0_11 = arith.constant 0 : index
      %13 = vector.load %arg7[%c0_10, %c0_11] : memref<16x96xf32, #tpu.memory_space<vmem>>, vector<16x96xf32>
      %c0_12 = arith.constant 0 : index
      %c0_13 = arith.constant 0 : index
      %14 = vector.load %arg5[%c0_12, %c0_13] : memref<1x96xf32, #tpu.memory_space<vmem>>, vector<1x96xf32>
      %15 = vector.broadcast %14 : vector<1x96xf32> to vector<16x96xf32>
      %16 = arith.addf %13, %15 : vector<16x96xf32>
      %17 = arith.truncf %16 : vector<16x96xf32> to vector<16x96xbf16>
      %c0_14 = arith.constant 0 : index
      %c0_15 = arith.constant 0 : index
      %18 = vector.load %arg6[%c0_14, %c0_15] : memref<16x96xbf16, #tpu.memory_space<vmem>>, vector<16x96xbf16>
      tpu.vector_store %arg6[%c0_14, %c0_15], %17 {strides = array<i32>} : memref<16x96xbf16, #tpu.memory_space<vmem>>, vector<16x96xbf16>,
    } else {
    }
    return
  }
  func.func @transform_0(%arg0: i32, %arg1: i32, %arg2: i32) -> (i32, i32) {
    %c0_i32 = arith.constant 0 : i32
    return %arg0, %arg2 : i32, i32
  }
  func.func @transform_1(%arg0: i32, %arg1: i32, %arg2: i32) -> (i32, i32) {
    %c0_i32 = arith.constant 0 : i32
    return %arg2, %arg1 : i32, i32
  }
  func.func @transform_2(%arg0: i32, %arg1: i32, %arg2: i32) -> (i32, i32) {
    %c0_i32 = arith.constant 0 : i32
    %c0_i32_0 = arith.constant 0 : i32
    return %c0_i32, %arg1 : i32, i32
  }
  func.func @transform_3(%arg0: i32, %arg1: i32, %arg2: i32) -> (i32, i32) {
    %c0_i32 = arith.constant 0 : i32
    return %arg0, %arg1 : i32, i32
  }
}

module attributes {stable_mosaic.version = 11 : i64} {
  func.func @_linear_kernel(%arg0: i32, %arg1: i32, %arg2: memref<1xf32, #tpu.memory_space<smem>>, %arg3: memref<16x32xf32, #tpu.memory_space<vmem>>, %arg4: memref<32x128xbf16, #tpu.memory_space<vmem>>, %arg5: memref<1x128xf32, #tpu.memory_space<vmem>>, %arg6: memref<1x128xf32, #tpu.memory_space<vmem>>, %arg7: memref<1x128xf32, #tpu.memory_space<vmem>>, %arg8: memref<1x128xf32, #tpu.memory_space<vmem>>, %arg9: memref<16x128xbf16, #tpu.memory_space<vmem>>, %arg10: memref<16x128xf32, #tpu.memory_space<vmem>>) attributes {dimension_semantics = [#tpu.dimension_semantics<parallel>, #tpu.dimension_semantics<arbitrary>], iteration_bounds = array<i64: 1, 1>, scalar_prefetch = 0 : i64, scratch_operands = 1 : i64, tpu.core_type = #tpu.core_type<tc>, window_params = [{transform_indices = @transform_0, window_bounds = array<i64: 1>}, {transform_indices = @transform_1, window_bounds = array<i64: 16, 32>}, {transform_indices = @transform_2, window_bounds = array<i64: 32, 128>}, {pipeline_mode = #tpu.pipeline_mode<synchronous>, transform_indices = @transform_3, window_bounds = array<i64: 1, 128>}, {pipeline_mode = #tpu.pipeline_mode<synchronous>, transform_indices = @transform_4, window_bounds = array<i64: 1, 128>}, {pipeline_mode = #tpu.pipeline_mode<synchronous>, transform_indices = @transform_5, window_bounds = array<i64: 1, 128>}, {pipeline_mode = #tpu.pipeline_mode<synchronous>, transform_indices = @transform_6, window_bounds = array<i64: 1, 128>}, {transform_indices = @transform_7, window_bounds = array<i64: 16, 128>}]} {
    %c0_i32 = arith.constant 0 : i32
    %0 = arith.cmpi eq, %arg1, %c0_i32 : i32
    %1 = arith.extui %0 : i1 to i32
    %c0_i32_0 = arith.constant 0 : i32
    %2 = arith.cmpi ne, %1, %c0_i32_0 : i32
    scf.if %2 {
      %cst_10 = arith.constant 0.000000e+00 : f32
      %13 = vector.broadcast %cst_10 : f32 to vector<16x128xf32>
      %c0_11 = arith.constant 0 : index
      %c0_12 = arith.constant 0 : index
      %14 = vector.load %arg10[%c0_11, %c0_12] : memref<16x128xf32, #tpu.memory_space<vmem>>, vector<16x128xf32>
      tpu.vector_store %arg10[%c0_11, %c0_12], %13 {strides = array<i32>} : memref<16x128xf32, #tpu.memory_space<vmem>>, vector<16x128xf32>,
    } else {
    }
    %c0 = arith.constant 0 : index
    %c0_1 = arith.constant 0 : index
    %3 = vector.load %arg10[%c0, %c0_1] : memref<16x128xf32, #tpu.memory_space<vmem>>, vector<16x128xf32>
    %c0_2 = arith.constant 0 : index
    %c0_3 = arith.constant 0 : index
    %4 = vector.load %arg3[%c0_2, %c0_3] : memref<16x32xf32, #tpu.memory_space<vmem>>, vector<16x32xf32>
    %5 = arith.truncf %4 : vector<16x32xf32> to vector<16x32xbf16>
    %c0_4 = arith.constant 0 : index
    %c0_5 = arith.constant 0 : index
    %6 = vector.load %arg4[%c0_4, %c0_5] : memref<32x128xbf16, #tpu.memory_space<vmem>>, vector<32x128xbf16>
    %cst = arith.constant dense<0.000000e+00> : vector<16x128xf32>
    %7 = tpu.matmul %5, %6, %cst {dimension_numbers = #tpu.dot_dimension_numbers<[1], [0], [0], [1], [0, 0, 1, 1], [], []>} : vector<16x32xbf16>, vector<32x128xbf16>, vector<16x128xf32> -> vector<16x128xf32>
    %8 = arith.addf %3, %7 : vector<16x128xf32>
    %c0_6 = arith.constant 0 : index
    %c0_7 = arith.constant 0 : index
    %9 = vector.load %arg10[%c0_6, %c0_7] : memref<16x128xf32, #tpu.memory_space<vmem>>, vector<16x128xf32>
    tpu.vector_store %arg10[%c0_6, %c0_7], %8 {strides = array<i32>} : memref<16x128xf32, #tpu.memory_space<vmem>>, vector<16x128xf32>,
    %c0_i32_8 = arith.constant 0 : i32
    %10 = arith.cmpi eq, %arg1, %c0_i32_8 : i32
    %11 = arith.extui %10 : i1 to i32
    %c0_i32_9 = arith.constant 0 : i32
    %12 = arith.cmpi ne, %11, %c0_i32_9 : i32
    scf.if %12 {
      %c0_10 = arith.constant 0 : index
      %c0_11 = arith.constant 0 : index
      %13 = vector.load %arg10[%c0_10, %c0_11] : memref<16x128xf32, #tpu.memory_space<vmem>>, vector<16x128xf32>
      %c0_12 = arith.constant 0 : index
      %c0_13 = arith.constant 0 : index
      %14 = vector.load %arg5[%c0_12, %c0_13] : memref<1x128xf32, #tpu.memory_space<vmem>>, vector<1x128xf32>
      %15 = vector.broadcast %14 : vector<1x128xf32> to vector<16x128xf32>
      %16 = arith.addf %13, %15 : vector<16x128xf32>
      %c0_14 = arith.constant 0 : index
      %17 = memref.load %arg2[%c0_14] : memref<1xf32, #tpu.memory_space<smem>>
      %c0_15 = arith.constant 0 : index
      %c0_16 = arith.constant 0 : index
      %18 = vector.load %arg6[%c0_15, %c0_16] : memref<1x128xf32, #tpu.memory_space<vmem>>, vector<1x128xf32>
      %c0_17 = arith.constant 0 : index
      %c0_18 = arith.constant 0 : index
      %19 = vector.load %arg7[%c0_17, %c0_18] : memref<1x128xf32, #tpu.memory_space<vmem>>, vector<1x128xf32>
      %c0_19 = arith.constant 0 : index
      %c0_20 = arith.constant 0 : index
      %20 = vector.load %arg8[%c0_19, %c0_20] : memref<1x128xf32, #tpu.memory_space<vmem>>, vector<1x128xf32>
      %cst_21 = arith.constant dense<0.000000e+00> : vector<16xf32>
      %21 = vector.multi_reduction <add>, %16, %cst_21 [1] : vector<16x128xf32> to vector<16xf32>
      %22 = vector.shape_cast %21 : vector<16xf32> to vector<16x1xf32>
      %cst_22 = arith.constant 1.280000e+02 : f32
      %23 = vector.broadcast %cst_22 : f32 to vector<16x1xf32>
      %24 = arith.divf %22, %23 : vector<16x1xf32>
      %25 = vector.broadcast %24 : vector<16x1xf32> to vector<16x128xf32>
      %26 = arith.subf %16, %25 : vector<16x128xf32>
      %27 = arith.mulf %26, %26 : vector<16x128xf32>
      %cst_23 = arith.constant dense<0.000000e+00> : vector<16xf32>
      %28 = vector.multi_reduction <add>, %27, %cst_23 [1] : vector<16x128xf32> to vector<16xf32>
      %29 = vector.shape_cast %28 : vector<16xf32> to vector<16x1xf32>
      %cst_24 = arith.constant 1.280000e+02 : f32
      %30 = vector.broadcast %cst_24 : f32 to vector<16x1xf32>
      %31 = arith.divf %29, %30 : vector<16x1xf32>
      %32 = vector.broadcast %24 : vector<16x1xf32> to vector<16x128xf32>
      %33 = arith.subf %16, %32 : vector<16x128xf32>
      %cst_25 = arith.constant 9.99999974E-6 : f32
      %34 = vector.broadcast %cst_25 : f32 to vector<16x1xf32>
      %35 = arith.addf %31, %34 : vector<16x1xf32>
      %36 = math.rsqrt %35 : vector<16x1xf32>
      %37 = vector.broadcast %36 : vector<16x1xf32> to vector<16x128xf32>
      %38 = arith.mulf %33, %37 : vector<16x128xf32>
      %39 = vector.broadcast %18 : vector<1x128xf32> to vector<16x128xf32>
      %40 = arith.mulf %38, %39 : vector<16x128xf32>
      %41 = vector.broadcast %19 : vector<1x128xf32> to vector<16x128xf32>
      %42 = arith.addf %40, %41 : vector<16x128xf32>
      %43 = math.absf %42 : vector<16x128xf32>
      %44 = vector.broadcast %20 : vector<1x128xf32> to vector<16x128xf32>
      %45 = arith.subf %43, %44 : vector<16x128xf32>
      %46 = arith.negf %45 : vector<16x128xf32>
      %47 = math.exp %46 : vector<16x128xf32>
      %cst_26 = arith.constant 1.000000e+00 : f32
      %48 = vector.broadcast %cst_26 : f32 to vector<16x128xf32>
      %49 = arith.addf %48, %47 : vector<16x128xf32>
      %50 = arith.divf %48, %49 : vector<16x128xf32>
      %51 = arith.mulf %50, %16 : vector<16x128xf32>
      %52 = vector.broadcast %17 : f32 to vector<16x128xf32>
      %53 = arith.mulf %52, %51 : vector<16x128xf32>
      %cst_27 = arith.constant 1.000000e+00 : f32
      %54 = arith.subf %cst_27, %17 : f32
      %55 = vector.broadcast %54 : f32 to vector<16x128xf32>
      %56 = arith.mulf %55, %16 : vector<16x128xf32>
      %57 = arith.addf %53, %56 : vector<16x128xf32>
      %cst_28 = arith.constant -1.000000e+02 : f32
      %cst_29 = arith.constant 1.000000e+02 : f32
      %58 = vector.broadcast %cst_28 : f32 to vector<16x128xf32>
      %59 = arith.maximumf %58, %57 : vector<16x128xf32>
      %60 = vector.broadcast %cst_29 : f32 to vector<16x128xf32>
      %61 = arith.minimumf %60, %59 : vector<16x128xf32>
      %cst_30 = arith.constant 5.000000e-01 : f32
      %62 = vector.broadcast %cst_30 : f32 to vector<16x128xf32>
      %63 = arith.mulf %62, %61 : vector<16x128xf32>
      %cst_31 = arith.constant 0.707106769 : f32
      %64 = vector.broadcast %cst_31 : f32 to vector<16x128xf32>
      %65 = arith.mulf %61, %64 : vector<16x128xf32>
      %cst_32 = arith.constant 0.000000e+00 : f32
      %66 = vector.broadcast %cst_32 : f32 to vector<16x128xf32>
      %67 = arith.cmpf oge, %65, %66 : vector<16x128xf32>
      %cst_33 = arith.constant 1.000000e+00 : f32
      %cst_34 = arith.constant -1.000000e+00 : f32
      %68 = vector.broadcast %cst_33 : f32 to vector<16x128xf32>
      %69 = vector.broadcast %cst_34 : f32 to vector<16x128xf32>
      %70 = arith.select %67, %68, %69 : vector<16x128xi1>, vector<16x128xf32>
      %71 = math.absf %65 : vector<16x128xf32>
      %cst_35 = arith.constant 0.327591091 : f32
      %72 = vector.broadcast %cst_35 : f32 to vector<16x128xf32>
      %73 = arith.mulf %72, %71 : vector<16x128xf32>
      %cst_36 = arith.constant 1.000000e+00 : f32
      %74 = vector.broadcast %cst_36 : f32 to vector<16x128xf32>
      %75 = arith.addf %74, %73 : vector<16x128xf32>
      %cst_37 = arith.constant 1.000000e+00 : f32
      %76 = vector.broadcast %cst_37 : f32 to vector<16x128xf32>
      %77 = arith.divf %76, %75 : vector<16x128xf32>
      %cst_38 = arith.constant 1.06140542 : f32
      %78 = vector.broadcast %cst_38 : f32 to vector<16x128xf32>
      %79 = arith.mulf %78, %77 : vector<16x128xf32>
      %cst_39 = arith.constant -1.45315206 : f32
      %80 = vector.broadcast %cst_39 : f32 to vector<16x128xf32>
      %81 = arith.addf %79, %80 : vector<16x128xf32>
      %82 = arith.mulf %81, %77 : vector<16x128xf32>
      %cst_40 = arith.constant 1.42141378 : f32
      %83 = vector.broadcast %cst_40 : f32 to vector<16x128xf32>
      %84 = arith.addf %82, %83 : vector<16x128xf32>
      %85 = arith.mulf %84, %77 : vector<16x128xf32>
      %cst_41 = arith.constant -0.284496725 : f32
      %86 = vector.broadcast %cst_41 : f32 to vector<16x128xf32>
      %87 = arith.addf %85, %86 : vector<16x128xf32>
      %88 = arith.mulf %87, %77 : vector<16x128xf32>
      %cst_42 = arith.constant 0.254829586 : f32
      %89 = vector.broadcast %cst_42 : f32 to vector<16x128xf32>
      %90 = arith.addf %88, %89 : vector<16x128xf32>
      %91 = arith.mulf %90, %77 : vector<16x128xf32>
      %cst_43 = arith.constant 0.000000e+00 : f32
      %92 = vector.broadcast %cst_43 : f32 to vector<16x128xf32>
      %93 = arith.subf %92, %71 : vector<16x128xf32>
      %94 = arith.mulf %93, %71 : vector<16x128xf32>
      %95 = math.exp %94 : vector<16x128xf32>
      %96 = arith.mulf %91, %95 : vector<16x128xf32>
      %cst_44 = arith.constant 1.000000e+00 : f32
      %97 = vector.broadcast %cst_44 : f32 to vector<16x128xf32>
      %98 = arith.subf %97, %96 : vector<16x128xf32>
      %99 = arith.mulf %70, %98 : vector<16x128xf32>
      %cst_45 = arith.constant 1.000000e+00 : f32
      %100 = vector.broadcast %cst_45 : f32 to vector<16x128xf32>
      %101 = arith.addf %100, %99 : vector<16x128xf32>
      %102 = arith.mulf %63, %101 : vector<16x128xf32>
      %103 = arith.truncf %102 : vector<16x128xf32> to vector<16x128xbf16>
      %c0_46 = arith.constant 0 : index
      %c0_47 = arith.constant 0 : index
      %104 = vector.load %arg9[%c0_46, %c0_47] : memref<16x128xbf16, #tpu.memory_space<vmem>>, vector<16x128xbf16>
      tpu.vector_store %arg9[%c0_46, %c0_47], %103 {strides = array<i32>} : memref<16x128xbf16, #tpu.memory_space<vmem>>, vector<16x128xbf16>,
    } else {
    }
    return
  }
  func.func @transform_0(%arg0: i32, %arg1: i32) -> i32 {
    %c0_i32 = arith.constant 0 : i32
    %c0_i32_0 = arith.constant 0 : i32
    return %c0_i32 : i32
  }
  func.func @transform_1(%arg0: i32, %arg1: i32) -> (i32, i32) {
    %c0_i32 = arith.constant 0 : i32
    return %arg0, %arg1 : i32, i32
  }
  func.func @transform_2(%arg0: i32, %arg1: i32) -> (i32, i32) {
    %c0_i32 = arith.constant 0 : i32
    %c0_i32_0 = arith.constant 0 : i32
    return %arg1, %c0_i32 : i32, i32
  }
  func.func @transform_3(%arg0: i32, %arg1: i32) -> (i32, i32) {
    %c0_i32 = arith.constant 0 : i32
    %c0_i32_0 = arith.constant 0 : i32
    %c0_i32_1 = arith.constant 0 : i32
    return %c0_i32, %c0_i32_0 : i32, i32
  }
  func.func @transform_4(%arg0: i32, %arg1: i32) -> (i32, i32) {
    %c0_i32 = arith.constant 0 : i32
    %c0_i32_0 = arith.constant 0 : i32
    %c0_i32_1 = arith.constant 0 : i32
    return %c0_i32, %c0_i32_0 : i32, i32
  }
  func.func @transform_5(%arg0: i32, %arg1: i32) -> (i32, i32) {
    %c0_i32 = arith.constant 0 : i32
    %c0_i32_0 = arith.constant 0 : i32
    %c0_i32_1 = arith.constant 0 : i32
    return %c0_i32, %c0_i32_0 : i32, i32
  }
  func.func @transform_6(%arg0: i32, %arg1: i32) -> (i32, i32) {
    %c0_i32 = arith.constant 0 : i32
    %c0_i32_0 = arith.constant 0 : i32
    %c0_i32_1 = arith.constant 0 : i32
    return %c0_i32, %c0_i32_0 : i32, i32
  }
  func.func @transform_7(%arg0: i32, %arg1: i32) -> (i32, i32) {
    %c0_i32 = arith.constant 0 : i32
    %c0_i32_0 = arith.constant 0 : i32
    return %arg0, %c0_i32 : i32, i32
  }
}

module attributes {stable_mosaic.version = 11 : i64} {
  func.func @_linear_kernel(%arg0: i32, %arg1: i32, %arg2: memref<1xf32, #tpu.memory_space<smem>>, %arg3: memref<16x128xbf16, #tpu.memory_space<vmem>>, %arg4: memref<128x32xbf16, #tpu.memory_space<vmem>>, %arg5: memref<1x32xf32, #tpu.memory_space<vmem>>, %arg6: memref<1x32xf32, #tpu.memory_space<vmem>>, %arg7: memref<1x32xf32, #tpu.memory_space<vmem>>, %arg8: memref<1x32xf32, #tpu.memory_space<vmem>>, %arg9: memref<16x32xf32, #tpu.memory_space<vmem>>, %arg10: memref<16x32xf32, #tpu.memory_space<vmem>>) attributes {dimension_semantics = [#tpu.dimension_semantics<parallel>, #tpu.dimension_semantics<arbitrary>], iteration_bounds = array<i64: 1, 1>, scalar_prefetch = 0 : i64, scratch_operands = 0 : i64, tpu.core_type = #tpu.core_type<tc>, window_params = [{transform_indices = @transform_0, window_bounds = array<i64: 1>}, {transform_indices = @transform_1, window_bounds = array<i64: 16, 128>}, {transform_indices = @transform_2, window_bounds = array<i64: 128, 32>}, {pipeline_mode = #tpu.pipeline_mode<synchronous>, transform_indices = @transform_3, window_bounds = array<i64: 1, 32>}, {pipeline_mode = #tpu.pipeline_mode<synchronous>, transform_indices = @transform_4, window_bounds = array<i64: 1, 32>}, {pipeline_mode = #tpu.pipeline_mode<synchronous>, transform_indices = @transform_5, window_bounds = array<i64: 1, 32>}, {pipeline_mode = #tpu.pipeline_mode<synchronous>, transform_indices = @transform_6, window_bounds = array<i64: 1, 32>}, {transform_indices = @transform_7, window_bounds = array<i64: 16, 32>}, {transform_indices = @transform_8, window_bounds = array<i64: 16, 32>}]} {
    %c0_i32 = arith.constant 0 : i32
    %0 = arith.cmpi eq, %arg1, %c0_i32 : i32
    %1 = arith.extui %0 : i1 to i32
    %c0_i32_0 = arith.constant 0 : i32
    %2 = arith.cmpi ne, %1, %c0_i32_0 : i32
    scf.if %2 {
      %cst_10 = arith.constant 0.000000e+00 : f32
      %12 = vector.broadcast %cst_10 : f32 to vector<16x32xf32>
      %c0_11 = arith.constant 0 : index
      %c0_12 = arith.constant 0 : index
      %13 = vector.load %arg10[%c0_11, %c0_12] : memref<16x32xf32, #tpu.memory_space<vmem>>, vector<16x32xf32>
      tpu.vector_store %arg10[%c0_11, %c0_12], %12 {strides = array<i32>} : memref<16x32xf32, #tpu.memory_space<vmem>>, vector<16x32xf32>,
    } else {
    }
    %c0 = arith.constant 0 : index
    %c0_1 = arith.constant 0 : index
    %3 = vector.load %arg10[%c0, %c0_1] : memref<16x32xf32, #tpu.memory_space<vmem>>, vector<16x32xf32>
    %c0_2 = arith.constant 0 : index
    %c0_3 = arith.constant 0 : index
    %4 = vector.load %arg3[%c0_2, %c0_3] : memref<16x128xbf16, #tpu.memory_space<vmem>>, vector<16x128xbf16>
    %c0_4 = arith.constant 0 : index
    %c0_5 = arith.constant 0 : index
    %5 = vector.load %arg4[%c0_4, %c0_5] : memref<128x32xbf16, #tpu.memory_space<vmem>>, vector<128x32xbf16>
    %cst = arith.constant dense<0.000000e+00> : vector<16x32xf32>
    %6 = tpu.matmul %4, %5, %cst {dimension_numbers = #tpu.dot_dimension_numbers<[1], [0], [0], [1], [0, 0, 1, 1], [], []>} : vector<16x128xbf16>, vector<128x32xbf16>, vector<16x32xf32> -> vector<16x32xf32>
    %7 = arith.addf %3, %6 : vector<16x32xf32>
    %c0_6 = arith.constant 0 : index
    %c0_7 = arith.constant 0 : index
    %8 = vector.load %arg10[%c0_6, %c0_7] : memref<16x32xf32, #tpu.memory_space<vmem>>, vector<16x32xf32>
    tpu.vector_store %arg10[%c0_6, %c0_7], %7 {strides = array<i32>} : memref<16x32xf32, #tpu.memory_space<vmem>>, vector<16x32xf32>,
    %c0_i32_8 = arith.constant 0 : i32
    %9 = arith.cmpi eq, %arg1, %c0_i32_8 : i32
    %10 = arith.extui %9 : i1 to i32
    %c0_i32_9 = arith.constant 0 : i32
    %11 = arith.cmpi ne, %10, %c0_i32_9 : i32
    scf.if %11 {
      %c0_10 = arith.constant 0 : index
      %c0_11 = arith.constant 0 : index
      %12 = vector.load %arg10[%c0_10, %c0_11] : memref<16x32xf32, #tpu.memory_space<vmem>>, vector<16x32xf32>
      %c0_12 = arith.constant 0 : index
      %c0_13 = arith.constant 0 : index
      %13 = vector.load %arg5[%c0_12, %c0_13] : memref<1x32xf32, #tpu.memory_space<vmem>>, vector<1x32xf32>
      %14 = vector.broadcast %13 : vector<1x32xf32> to vector<16x32xf32>
      %15 = arith.addf %12, %14 : vector<16x32xf32>
      %c0_14 = arith.constant 0 : index
      %16 = memref.load %arg2[%c0_14] : memref<1xf32, #tpu.memory_space<smem>>
      %c0_15 = arith.constant 0 : index
      %c0_16 = arith.constant 0 : index
      %17 = vector.load %arg6[%c0_15, %c0_16] : memref<1x32xf32, #tpu.memory_space<vmem>>, vector<1x32xf32>
      %c0_17 = arith.constant 0 : index
      %c0_18 = arith.constant 0 : index
      %18 = vector.load %arg7[%c0_17, %c0_18] : memref<1x32xf32, #tpu.memory_space<vmem>>, vector<1x32xf32>
      %c0_19 = arith.constant 0 : index
      %c0_20 = arith.constant 0 : index
      %19 = vector.load %arg8[%c0_19, %c0_20] : memref<1x32xf32, #tpu.memory_space<vmem>>, vector<1x32xf32>
      %cst_21 = arith.constant dense<0.000000e+00> : vector<16xf32>
      %20 = vector.multi_reduction <add>, %15, %cst_21 [1] : vector<16x32xf32> to vector<16xf32>
      %21 = vector.shape_cast %20 : vector<16xf32> to vector<16x1xf32>
      %cst_22 = arith.constant 3.200000e+01 : f32
      %22 = vector.broadcast %cst_22 : f32 to vector<16x1xf32>
      %23 = arith.divf %21, %22 : vector<16x1xf32>
      %24 = vector.broadcast %23 : vector<16x1xf32> to vector<16x32xf32>
      %25 = arith.subf %15, %24 : vector<16x32xf32>
      %26 = arith.mulf %25, %25 : vector<16x32xf32>
      %cst_23 = arith.constant dense<0.000000e+00> : vector<16xf32>
      %27 = vector.multi_reduction <add>, %26, %cst_23 [1] : vector<16x32xf32> to vector<16xf32>
      %28 = vector.shape_cast %27 : vector<16xf32> to vector<16x1xf32>
      %cst_24 = arith.constant 3.200000e+01 : f32
      %29 = vector.broadcast %cst_24 : f32 to vector<16x1xf32>
      %30 = arith.divf %28, %29 : vector<16x1xf32>
      %31 = vector.broadcast %23 : vector<16x1xf32> to vector<16x32xf32>
      %32 = arith.subf %15, %31 : vector<16x32xf32>
      %cst_25 = arith.constant 9.99999974E-6 : f32
      %33 = vector.broadcast %cst_25 : f32 to vector<16x1xf32>
      %34 = arith.addf %30, %33 : vector<16x1xf32>
      %35 = math.rsqrt %34 : vector<16x1xf32>
      %36 = vector.broadcast %35 : vector<16x1xf32> to vector<16x32xf32>
      %37 = arith.mulf %32, %36 : vector<16x32xf32>
      %38 = vector.broadcast %17 : vector<1x32xf32> to vector<16x32xf32>
      %39 = arith.mulf %37, %38 : vector<16x32xf32>
      %40 = vector.broadcast %18 : vector<1x32xf32> to vector<16x32xf32>
      %41 = arith.addf %39, %40 : vector<16x32xf32>
      %42 = math.absf %41 : vector<16x32xf32>
      %43 = vector.broadcast %19 : vector<1x32xf32> to vector<16x32xf32>
      %44 = arith.subf %42, %43 : vector<16x32xf32>
      %45 = arith.negf %44 : vector<16x32xf32>
      %46 = math.exp %45 : vector<16x32xf32>
      %cst_26 = arith.constant 1.000000e+00 : f32
      %47 = vector.broadcast %cst_26 : f32 to vector<16x32xf32>
      %48 = arith.addf %47, %46 : vector<16x32xf32>
      %49 = arith.divf %47, %48 : vector<16x32xf32>
      %50 = arith.mulf %49, %15 : vector<16x32xf32>
      %51 = vector.broadcast %16 : f32 to vector<16x32xf32>
      %52 = arith.mulf %51, %50 : vector<16x32xf32>
      %cst_27 = arith.constant 1.000000e+00 : f32
      %53 = arith.subf %cst_27, %16 : f32
      %54 = vector.broadcast %53 : f32 to vector<16x32xf32>
      %55 = arith.mulf %54, %15 : vector<16x32xf32>
      %56 = arith.addf %52, %55 : vector<16x32xf32>
      %cst_28 = arith.constant -1.000000e+02 : f32
      %cst_29 = arith.constant 1.000000e+02 : f32
      %57 = vector.broadcast %cst_28 : f32 to vector<16x32xf32>
      %58 = arith.maximumf %57, %56 : vector<16x32xf32>
      %59 = vector.broadcast %cst_29 : f32 to vector<16x32xf32>
      %60 = arith.minimumf %59, %58 : vector<16x32xf32>
      %c0_30 = arith.constant 0 : index
      %c0_31 = arith.constant 0 : index
      %61 = vector.load %arg9[%c0_30, %c0_31] : memref<16x32xf32, #tpu.memory_space<vmem>>, vector<16x32xf32>
      %62 = arith.addf %61, %60 : vector<16x32xf32>
      %c0_32 = arith.constant 0 : index
      %c0_33 = arith.constant 0 : index
      %63 = vector.load %arg10[%c0_32, %c0_33] : memref<16x32xf32, #tpu.memory_space<vmem>>, vector<16x32xf32>
      tpu.vector_store %arg10[%c0_32, %c0_33], %62 {strides = array<i32>} : memref<16x32xf32, #tpu.memory_space<vmem>>, vector<16x32xf32>,
    } else {
    }
    return
  }
  func.func @transform_0(%arg0: i32, %arg1: i32) -> i32 {
    %c0_i32 = arith.constant 0 : i32
    %c0_i32_0 = arith.constant 0 : i32
    return %c0_i32 : i32
  }
  func.func @transform_1(%arg0: i32, %arg1: i32) -> (i32, i32) {
    %c0_i32 = arith.constant 0 : i32
    return %arg0, %arg1 : i32, i32
  }
  func.func @transform_2(%arg0: i32, %arg1: i32) -> (i32, i32) {
    %c0_i32 = arith.constant 0 : i32
    %c0_i32_0 = arith.constant 0 : i32
    return %arg1, %c0_i32 : i32, i32
  }
  func.func @transform_3(%arg0: i32, %arg1: i32) -> (i32, i32) {
    %c0_i32 = arith.constant 0 : i32
    %c0_i32_0 = arith.constant 0 : i32
    %c0_i32_1 = arith.constant 0 : i32
    return %c0_i32, %c0_i32_0 : i32, i32
  }
  func.func @transform_4(%arg0: i32, %arg1: i32) -> (i32, i32) {
    %c0_i32 = arith.constant 0 : i32
    %c0_i32_0 = arith.constant 0 : i32
    %c0_i32_1 = arith.constant 0 : i32
    return %c0_i32, %c0_i32_0 : i32, i32
  }
  func.func @transform_5(%arg0: i32, %arg1: i32) -> (i32, i32) {
    %c0_i32 = arith.constant 0 : i32
    %c0_i32_0 = arith.constant 0 : i32
    %c0_i32_1 = arith.constant 0 : i32
    return %c0_i32, %c0_i32_0 : i32, i32
  }
  func.func @transform_6(%arg0: i32, %arg1: i32) -> (i32, i32) {
    %c0_i32 = arith.constant 0 : i32
    %c0_i32_0 = arith.constant 0 : i32
    %c0_i32_1 = arith.constant 0 : i32
    return %c0_i32, %c0_i32_0 : i32, i32
  }
  func.func @transform_7(%arg0: i32, %arg1: i32) -> (i32, i32) {
    %c0_i32 = arith.constant 0 : i32
    %c0_i32_0 = arith.constant 0 : i32
    return %arg0, %c0_i32 : i32, i32
  }
  func.func @transform_8(%arg0: i32, %arg1: i32) -> (i32, i32) {
    %c0_i32 = arith.constant 0 : i32
    %c0_i32_0 = arith.constant 0 : i32
    return %arg0, %c0_i32 : i32, i32
  }
}

module attributes {stable_mosaic.version = 11 : i64} {
  func.func @_threshold_kernel(%arg0: i32, %arg1: memref<1xf32, #tpu.memory_space<smem>>, %arg2: memref<16x32xf32, #tpu.memory_space<vmem>>, %arg3: memref<1x32xf32, #tpu.memory_space<vmem>>, %arg4: memref<1x32xf32, #tpu.memory_space<vmem>>, %arg5: memref<1x32xf32, #tpu.memory_space<vmem>>, %arg6: memref<16x32xbf16, #tpu.memory_space<vmem>>) attributes {dimension_semantics = [#tpu.dimension_semantics<parallel>], iteration_bounds = array<i64: 1>, scalar_prefetch = 0 : i64, scratch_operands = 0 : i64, tpu.core_type = #tpu.core_type<tc>, window_params = [{transform_indices = @transform_0, window_bounds = array<i64: 1>}, {transform_indices = @transform_1, window_bounds = array<i64: 16, 32>}, {pipeline_mode = #tpu.pipeline_mode<synchronous>, transform_indices = @transform_2, window_bounds = array<i64: 1, 32>}, {pipeline_mode = #tpu.pipeline_mode<synchronous>, transform_indices = @transform_3, window_bounds = array<i64: 1, 32>}, {pipeline_mode = #tpu.pipeline_mode<synchronous>, transform_indices = @transform_4, window_bounds = array<i64: 1, 32>}, {transform_indices = @transform_5, window_bounds = array<i64: 16, 32>}]} {
    %c0 = arith.constant 0 : index
    %c0_0 = arith.constant 0 : index
    %0 = vector.load %arg2[%c0, %c0_0] : memref<16x32xf32, #tpu.memory_space<vmem>>, vector<16x32xf32>
    %c0_1 = arith.constant 0 : index
    %1 = memref.load %arg1[%c0_1] : memref<1xf32, #tpu.memory_space<smem>>
    %c0_2 = arith.constant 0 : index
    %c0_3 = arith.constant 0 : index
    %2 = vector.load %arg3[%c0_2, %c0_3] : memref<1x32xf32, #tpu.memory_space<vmem>>, vector<1x32xf32>
    %c0_4 = arith.constant 0 : index
    %c0_5 = arith.constant 0 : index
    %3 = vector.load %arg4[%c0_4, %c0_5] : memref<1x32xf32, #tpu.memory_space<vmem>>, vector<1x32xf32>
    %c0_6 = arith.constant 0 : index
    %c0_7 = arith.constant 0 : index
    %4 = vector.load %arg5[%c0_6, %c0_7] : memref<1x32xf32, #tpu.memory_space<vmem>>, vector<1x32xf32>
    %cst = arith.constant dense<0.000000e+00> : vector<16xf32>
    %5 = vector.multi_reduction <add>, %0, %cst [1] : vector<16x32xf32> to vector<16xf32>
    %6 = vector.shape_cast %5 : vector<16xf32> to vector<16x1xf32>
    %cst_8 = arith.constant 3.200000e+01 : f32
    %7 = vector.broadcast %cst_8 : f32 to vector<16x1xf32>
    %8 = arith.divf %6, %7 : vector<16x1xf32>
    %9 = vector.broadcast %8 : vector<16x1xf32> to vector<16x32xf32>
    %10 = arith.subf %0, %9 : vector<16x32xf32>
    %11 = arith.mulf %10, %10 : vector<16x32xf32>
    %cst_9 = arith.constant dense<0.000000e+00> : vector<16xf32>
    %12 = vector.multi_reduction <add>, %11, %cst_9 [1] : vector<16x32xf32> to vector<16xf32>
    %13 = vector.shape_cast %12 : vector<16xf32> to vector<16x1xf32>
    %cst_10 = arith.constant 3.200000e+01 : f32
    %14 = vector.broadcast %cst_10 : f32 to vector<16x1xf32>
    %15 = arith.divf %13, %14 : vector<16x1xf32>
    %16 = vector.broadcast %8 : vector<16x1xf32> to vector<16x32xf32>
    %17 = arith.subf %0, %16 : vector<16x32xf32>
    %cst_11 = arith.constant 9.99999974E-6 : f32
    %18 = vector.broadcast %cst_11 : f32 to vector<16x1xf32>
    %19 = arith.addf %15, %18 : vector<16x1xf32>
    %20 = math.rsqrt %19 : vector<16x1xf32>
    %21 = vector.broadcast %20 : vector<16x1xf32> to vector<16x32xf32>
    %22 = arith.mulf %17, %21 : vector<16x32xf32>
    %23 = vector.broadcast %2 : vector<1x32xf32> to vector<16x32xf32>
    %24 = arith.mulf %22, %23 : vector<16x32xf32>
    %25 = vector.broadcast %3 : vector<1x32xf32> to vector<16x32xf32>
    %26 = arith.addf %24, %25 : vector<16x32xf32>
    %27 = math.absf %26 : vector<16x32xf32>
    %28 = vector.broadcast %4 : vector<1x32xf32> to vector<16x32xf32>
    %29 = arith.subf %27, %28 : vector<16x32xf32>
    %30 = arith.negf %29 : vector<16x32xf32>
    %31 = math.exp %30 : vector<16x32xf32>
    %cst_12 = arith.constant 1.000000e+00 : f32
    %32 = vector.broadcast %cst_12 : f32 to vector<16x32xf32>
    %33 = arith.addf %32, %31 : vector<16x32xf32>
    %34 = arith.divf %32, %33 : vector<16x32xf32>
    %35 = arith.mulf %34, %0 : vector<16x32xf32>
    %36 = vector.broadcast %1 : f32 to vector<16x32xf32>
    %37 = arith.mulf %36, %35 : vector<16x32xf32>
    %cst_13 = arith.constant 1.000000e+00 : f32
    %38 = arith.subf %cst_13, %1 : f32
    %39 = vector.broadcast %38 : f32 to vector<16x32xf32>
    %40 = arith.mulf %39, %0 : vector<16x32xf32>
    %41 = arith.addf %37, %40 : vector<16x32xf32>
    %cst_14 = arith.constant -1.000000e+02 : f32
    %cst_15 = arith.constant 1.000000e+02 : f32
    %42 = vector.broadcast %cst_14 : f32 to vector<16x32xf32>
    %43 = arith.maximumf %42, %41 : vector<16x32xf32>
    %44 = vector.broadcast %cst_15 : f32 to vector<16x32xf32>
    %45 = arith.minimumf %44, %43 : vector<16x32xf32>
    %46 = arith.truncf %45 : vector<16x32xf32> to vector<16x32xbf16>
    %c0_16 = arith.constant 0 : index
    %c0_17 = arith.constant 0 : index
    %47 = vector.load %arg6[%c0_16, %c0_17] : memref<16x32xbf16, #tpu.memory_space<vmem>>, vector<16x32xbf16>
    tpu.vector_store %arg6[%c0_16, %c0_17], %46 {strides = array<i32>} : memref<16x32xbf16, #tpu.memory_space<vmem>>, vector<16x32xbf16>,
    return
  }
  func.func @transform_0(%arg0: i32) -> i32 {
    %c0_i32 = arith.constant 0 : i32
    %c0_i32_0 = arith.constant 0 : i32
    return %c0_i32 : i32
  }
  func.func @transform_1(%arg0: i32) -> (i32, i32) {
    %c0_i32 = arith.constant 0 : i32
    %c0_i32_0 = arith.constant 0 : i32
    return %arg0, %c0_i32 : i32, i32
  }
  func.func @transform_2(%arg0: i32) -> (i32, i32) {
    %c0_i32 = arith.constant 0 : i32
    %c0_i32_0 = arith.constant 0 : i32
    %c0_i32_1 = arith.constant 0 : i32
    return %c0_i32, %c0_i32_0 : i32, i32
  }
  func.func @transform_3(%arg0: i32) -> (i32, i32) {
    %c0_i32 = arith.constant 0 : i32
    %c0_i32_0 = arith.constant 0 : i32
    %c0_i32_1 = arith.constant 0 : i32
    return %c0_i32, %c0_i32_0 : i32, i32
  }
  func.func @transform_4(%arg0: i32) -> (i32, i32) {
    %c0_i32 = arith.constant 0 : i32
    %c0_i32_0 = arith.constant 0 : i32
    %c0_i32_1 = arith.constant 0 : i32
    return %c0_i32, %c0_i32_0 : i32, i32
  }
  func.func @transform_5(%arg0: i32) -> (i32, i32) {
    %c0_i32 = arith.constant 0 : i32
    %c0_i32_0 = arith.constant 0 : i32
    return %arg0, %c0_i32 : i32, i32
  }
}

module attributes {stable_mosaic.version = 11 : i64} {
  func.func @_linear_kernel(%arg0: i32, %arg1: i32, %arg2: i32, %arg3: memref<16x32xbf16, #tpu.memory_space<vmem>>, %arg4: memref<32x64xbf16, #tpu.memory_space<vmem>>, %arg5: memref<1x64xf32, #tpu.memory_space<vmem>>, %arg6: memref<16x64xf32, #tpu.memory_space<vmem>>) attributes {dimension_semantics = [#tpu.dimension_semantics<parallel>, #tpu.dimension_semantics<parallel>, #tpu.dimension_semantics<arbitrary>], iteration_bounds = array<i64: 1, 1, 1>, scalar_prefetch = 0 : i64, scratch_operands = 0 : i64, tpu.core_type = #tpu.core_type<tc>, window_params = [{transform_indices = @transform_0, window_bounds = array<i64: 16, 32>}, {transform_indices = @transform_1, window_bounds = array<i64: 32, 64>}, {transform_indices = @transform_2, window_bounds = array<i64: 1, 64>}, {transform_indices = @transform_3, window_bounds = array<i64: 16, 64>}]} {
    %c0_i32 = arith.constant 0 : i32
    %0 = arith.cmpi eq, %arg2, %c0_i32 : i32
    %1 = arith.extui %0 : i1 to i32
    %c0_i32_0 = arith.constant 0 : i32
    %2 = arith.cmpi ne, %1, %c0_i32_0 : i32
    scf.if %2 {
      %cst_10 = arith.constant 0.000000e+00 : f32
      %12 = vector.broadcast %cst_10 : f32 to vector<16x64xf32>
      %c0_11 = arith.constant 0 : index
      %c0_12 = arith.constant 0 : index
      %13 = vector.load %arg6[%c0_11, %c0_12] : memref<16x64xf32, #tpu.memory_space<vmem>>, vector<16x64xf32>
      tpu.vector_store %arg6[%c0_11, %c0_12], %12 {strides = array<i32>} : memref<16x64xf32, #tpu.memory_space<vmem>>, vector<16x64xf32>,
    } else {
    }
    %c0 = arith.constant 0 : index
    %c0_1 = arith.constant 0 : index
    %3 = vector.load %arg6[%c0, %c0_1] : memref<16x64xf32, #tpu.memory_space<vmem>>, vector<16x64xf32>
    %c0_2 = arith.constant 0 : index
    %c0_3 = arith.constant 0 : index
    %4 = vector.load %arg3[%c0_2, %c0_3] : memref<16x32xbf16, #tpu.memory_space<vmem>>, vector<16x32xbf16>
    %c0_4 = arith.constant 0 : index
    %c0_5 = arith.constant 0 : index
    %5 = vector.load %arg4[%c0_4, %c0_5] : memref<32x64xbf16, #tpu.memory_space<vmem>>, vector<32x64xbf16>
    %cst = arith.constant dense<0.000000e+00> : vector<16x64xf32>
    %6 = tpu.matmul %4, %5, %cst {dimension_numbers = #tpu.dot_dimension_numbers<[1], [0], [0], [1], [0, 0, 1, 1], [], []>} : vector<16x32xbf16>, vector<32x64xbf16>, vector<16x64xf32> -> vector<16x64xf32>
    %7 = arith.addf %3, %6 : vector<16x64xf32>
    %c0_6 = arith.constant 0 : index
    %c0_7 = arith.constant 0 : index
    %8 = vector.load %arg6[%c0_6, %c0_7] : memref<16x64xf32, #tpu.memory_space<vmem>>, vector<16x64xf32>
    tpu.vector_store %arg6[%c0_6, %c0_7], %7 {strides = array<i32>} : memref<16x64xf32, #tpu.memory_space<vmem>>, vector<16x64xf32>,
    %c0_i32_8 = arith.constant 0 : i32
    %9 = arith.cmpi eq, %arg2, %c0_i32_8 : i32
    %10 = arith.extui %9 : i1 to i32
    %c0_i32_9 = arith.constant 0 : i32
    %11 = arith.cmpi ne, %10, %c0_i32_9 : i32
    scf.if %11 {
      %c0_10 = arith.constant 0 : index
      %c0_11 = arith.constant 0 : index
      %12 = vector.load %arg6[%c0_10, %c0_11] : memref<16x64xf32, #tpu.memory_space<vmem>>, vector<16x64xf32>
      %c0_12 = arith.constant 0 : index
      %c0_13 = arith.constant 0 : index
      %13 = vector.load %arg5[%c0_12, %c0_13] : memref<1x64xf32, #tpu.memory_space<vmem>>, vector<1x64xf32>
      %14 = vector.broadcast %13 : vector<1x64xf32> to vector<16x64xf32>
      %15 = arith.addf %12, %14 : vector<16x64xf32>
      %c0_14 = arith.constant 0 : index
      %c0_15 = arith.constant 0 : index
      %16 = vector.load %arg6[%c0_14, %c0_15] : memref<16x64xf32, #tpu.memory_space<vmem>>, vector<16x64xf32>
      tpu.vector_store %arg6[%c0_14, %c0_15], %15 {strides = array<i32>} : memref<16x64xf32, #tpu.memory_space<vmem>>, vector<16x64xf32>,
    } else {
    }
    return
  }
  func.func @transform_0(%arg0: i32, %arg1: i32, %arg2: i32) -> (i32, i32) {
    %c0_i32 = arith.constant 0 : i32
    return %arg0, %arg2 : i32, i32
  }
  func.func @transform_1(%arg0: i32, %arg1: i32, %arg2: i32) -> (i32, i32) {
    %c0_i32 = arith.constant 0 : i32
    return %arg2, %arg1 : i32, i32
  }
  func.func @transform_2(%arg0: i32, %arg1: i32, %arg2: i32) -> (i32, i32) {
    %c0_i32 = arith.constant 0 : i32
    %c0_i32_0 = arith.constant 0 : i32
    return %c0_i32, %arg1 : i32, i32
  }
  func.func @transform_3(%arg0: i32, %arg1: i32, %arg2: i32) -> (i32, i32) {
    %c0_i32 = arith.constant 0 : i32
    return %arg0, %arg1 : i32, i32
  }
}

</mosaic_0001>

<bundles_post_ra>
// kernel: byte_transformer_forward.14
= control target key start
LH: loop header
LB: loop body
LE: loop exit
PB: predicated region body
PF: predicated region fallthrough
CT: control target
= control target key end

     0   :  { %vm35_vm0 = vcmask 261120   ;;  %v271_v1 = vmov 0.0   ;;  %v272_v17 = vmov 32.0   ;;  %s404_s2 = inlined_call_operand.vmem [shape: bf16[32,32], index: 2, kind: input, shape index: {}]   ;;  %s405_s8 = inlined_call_operand.vmem [shape: f32[16,32], index: 8, kind: output, shape index: {}]   ;;  %s406_s1 = inlined_call_operand.vmem [shape: bf16[16,32], index: 1, kind: input, shape index: {}]   ;;  %s407_s3 = inlined_call_operand.vmem [shape: f32[1,32], index: 3, kind: input, shape index: {}]   ;;  %s408_s4 = inlined_call_operand.vmem [shape: f32[1,32], index: 4, kind: input, shape index: {}]   ;;  %s409_s5 = inlined_call_operand.vmem [shape: f32[1,32], index: 5, kind: input, shape index: {}]   ;;  %s410_s6 = inlined_call_operand.vmem [shape: f32[1,32], index: 6, kind: input, shape index: {}]   ;;  %s411_s0 = inlined_call_operand.<no memory space> [shape: f32[1], index: 0, kind: input, shape index: {}]   ;;  %s412_s7 = inlined_call_operand.vmem [shape: f32[16,32], index: 7, kind: input, shape index: {}]  }
   0x1   :  { %v250_v0 = vld [vmem:[%s404_s2 + $0x8] sm:$0xff]  ;;  %36 = vst.msk [vmem:[%s405_s8] sm:$0xff] %vm35_vm0, %v271_v1  ;;  %v249_v2 = vld [vmem:[%s404_s2] sm:$0xff]  ;;  %257 = vrcp.f32 %v272_v17 }
   0x2   :  { %37 = vst.msk [vmem:[%s405_s8 + $0x8] sm:$0xff] %vm35_vm0, %v271_v1  ;;  %73 = vmatpush.bf16.msra.mxu0 %v250_v0  ;;  %v248_v3 = vld [vmem:[%s406_s1] sm:$0xff] }
   0x3   :  { %v253_v8 = vld [vmem:[%s407_s3] ss:$0 sm:$0xff] }
   0x4   :  { %v254_v48 = vld [vmem:[%s408_s4] ss:$0 sm:$0xff] }
   0x5   :  { %v255_v51 = vld [vmem:[%s409_s5] ss:$0 sm:$0xff] }
   0x6   :  { %74 = vmatpush.bf16.msra.mxu0 %v249_v2  ;;  %v256_v56 = vld [vmem:[%s410_s6] ss:$0 sm:$0xff]  ;;  %s211_s6 = ssub.f32 1.0, %s411_s0 }
   0x7   :  { %v258_v18 = vpop.eup %257 }
   0x8   :  { %v38_v4 = vld [vmem:[%s405_s8] sm:$0xff]  ;;  %v107_v19 = vmul.f32 32.0, %v258_v18  ;;  %vm111_vm1 = vweird.f32 %v258_v18 }
   0x9   :  { %243 = vmatmul.msk.bf16.vlgmr.msra.gmra.mxu0 %vm35_vm0, %v248_v3  ;;  %v39_v7 = vld [vmem:[%s405_s8 + $0x8] sm:$0xff] }
   0xa   :  { %v108_v20 = vsub.f32 1.0, %v107_v19 }
   0xc   :  { %v109_v21 = vmul.f32 %v258_v18, %v108_v20  ;;  %v212_v20 = vstv %s211_s6 }
   0xe   :  { %v110_v22 = vadd.f32 %v258_v18, %v109_v21 }
  0x10   :  { %v112_v23 = vsel %vm111_vm1, %v258_v18, %v110_v22 }
  0x86   :  { %v76_v5 = vpop.f32.mrf.mxu0 }
  0x87   :  { %v81_v6 = vadd.f32 %v76_v5, %v38_v4 }
  0x89   :  { %83 = vst.msk [vmem:[%s405_s8] sm:$0xff] %vm35_vm0, %v81_v6 }
  0x8e   :  { %v78_v9 = vpop.f32.mrf.mxu0 }
  0x8f   :  { %v82_v10 = vadd.f32 %v78_v9, %v39_v7 }
  0x90   :  { %v88_v11 = vld [vmem:[%s405_s8] sm:$0xff] }
  0x91   :  { %84 = vst.msk [vmem:[%s405_s8 + $0x8] sm:$0xff] %vm35_vm0, %v82_v10  ;;  %v356_v12 = vadd.f32 %v253_v8, %v88_v11 }
  0x93   :  { %v100_v13 = vsel %vm35_vm0, %v356_v12, 0.0 }
  0x94   :  { %101 = vadd.xlane.f32.xlu0 %v100_v13 }
  0x98   :  { %v89_v14 = vld [vmem:[%s405_s8 + $0x8] sm:$0xff] }
  0x99   :  { %v363_v15 = vadd.f32 %v253_v8, %v89_v14 }
  0x9b   :  { %v103_v16 = vsel %vm35_vm0, %v363_v15, 0.0 }
  0x9c   :  { %104 = vadd.xlane.f32.xlu0 %v103_v16 }
 0x107   :  { %v102_v24 = vpop.xlane.xlu0 %101 }
 0x108   :  { %v113_v25 = vmul.f32 %v112_v23, %v102_v24 }
 0x10a   :  { %v115_v26 = vsub.f32 %v356_v12, %v113_v25 }
 0x10c   :  { %v117_v27 = vmul.f32 %v115_v26, %v115_v26 }
 0x10e   :  { %v119_v28 = vsel %vm35_vm0, %v117_v27, 0.0  ;;  %v213_v27 = vmul.f32 %v212_v20, %v356_v12 }
 0x10f   :  { %120 = vadd.xlane.f32.xlu1 %v119_v28  ;;  %v105_v29 = vpop.xlane.xlu0 %104 }
 0x110   :  { %v114_v30 = vmul.f32 %v112_v23, %v105_v29 }
 0x112   :  { %v116_v31 = vsub.f32 %v363_v15, %v114_v30 }
 0x114   :  { %v118_v32 = vmul.f32 %v116_v31, %v116_v31 }
 0x116   :  { %v122_v33 = vsel %vm35_vm0, %v118_v32, 0.0 }
 0x117   :  { %123 = vadd.xlane.f32.xlu1 %v122_v33 }
 0x182   :  { %v121_v34 = vpop.xlane.xlu1 %120 }
 0x183   :  { %v125_v35 = vmul.f32 %v121_v34, %v112_v23  ;;  %v221_v34 = vld [vmem:[%s412_s7] sm:$0xff] }
 0x185   :  { %v127_v36 = vadd.f32 1e-05, %v125_v35 }
 0x187   :  { %259 = vrsqrt.f32 %v127_v36  ;;  %vm135_vm3 = vweird.f32 %v127_v36 }
 0x18a   :  { %v124_v37 = vpop.xlane.xlu1 %123 }
 0x18b   :  { %v126_v38 = vmul.f32 %v124_v37, %v112_v23  ;;  %v208_v23 = vstv %s411_s0 }
 0x18d   :  { %v260_v39 = vpop.eup %259  ;;  %v128_v40 = vadd.f32 1e-05, %v126_v38 }
 0x18e   :  { %v130_v41 = vmul.f32 %v260_v39, %v127_v36  ;;  %vm136_vm2 = vweird.f32 %v260_v39 }
 0x18f   :  { %261 = vrsqrt.f32 %v128_v40  ;;  %vm137_vm4 = vmor %vm135_vm3, %vm136_vm2  ;;  %vm145_vm6 = vweird.f32 %v128_v40 }
 0x190   :  { %v131_v42 = vmul.f32 %v260_v39, %v130_v41 }
 0x192   :  { %v132_v43 = vmul.f32 0.5, %v131_v42 }
 0x194   :  { %v133_v44 = vsub.f32 1.5, %v132_v43  ;;  %v222_v43 = vld [vmem:[%s412_s7 + $0x8] sm:$0xff] }
 0x195   :  { %v262_v45 = vpop.eup %261 }
 0x196   :  { %v134_v46 = vmul.f32 %v260_v39, %v133_v44  ;;  %v140_v47 = vmul.f32 %v262_v45, %v128_v40  ;;  %vm146_vm5 = vweird.f32 %v262_v45  ;;  %v214_v40 = vmul.f32 %v212_v20, %v363_v15 }
 0x197   :  { %vm147_vm7 = vmor %vm145_vm6, %vm146_vm5 }
 0x198   :  { %v138_v49 = vsel %vm137_vm4, %v260_v39, %v134_v46  ;;  %v141_v50 = vmul.f32 %v262_v45, %v140_v47 }
 0x199   :  { %v149_v52 = vmul.f32 %v138_v49, %v115_v26 }
 0x19a   :  { %v142_v53 = vmul.f32 0.5, %v141_v50 }
 0x19b   :  { %v154_v54 = vmul.f32 %v254_v48, %v149_v52 }
 0x19c   :  { %v143_v55 = vsub.f32 1.5, %v142_v53 }
 0x19d   :  { %v159_v57 = vadd.f32 %v255_v51, %v154_v54 }
 0x19e   :  { %v144_v58 = vmul.f32 %v262_v45, %v143_v55 }
 0x19f   :  { %v161_v59 = vand.u32 2147483647, %v159_v57 }
 0x1a0   :  { %v148_v60 = vsel %vm147_vm7, %v262_v45, %v144_v58 }
 0x1a1   :  { %v166_v61 = vsub.f32 %v161_v59, %v256_v56  ;;  %v150_v62 = vmul.f32 %v148_v60, %v116_v31 }
 0x1a3   :  { %v244_v63 = vmul.f32 -1.442695, %v166_v61  ;;  %v155_v0 = vmul.f32 %v254_v48, %v150_v62 }
 0x1a5   :  { %263 = vpow2.f32 %v244_v63  ;;  %v160_v1 = vadd.f32 %v255_v51, %v155_v0 }
 0x1a7   :  { %v162_v2 = vand.u32 2147483647, %v160_v1 }
 0x1a9   :  { %v167_v3 = vsub.f32 %v162_v2, %v256_v56 }
 0x1ab   :  { %v264_v4 = vpop.eup %263  ;;  %v245_v5 = vmul.f32 -1.442695, %v167_v3 }
 0x1ac   :  { %v174_v6 = vadd.f32 1.0, %v264_v4 }
 0x1ad   :  { %265 = vpow2.f32 %v245_v5 }
 0x1ae   :  { %267 = vrcp.f32 %v174_v6  ;;  %v187_v13 = vand.u32 2147483648, %v174_v6  ;;  %v185_v16 = vand.u32 2147483647, %v174_v6  ;;  %vm181_vm9 = vweird.f32 %v174_v6 }
 0x1b0   :  { %v188_v19 = vor.u32 1.1754944e-38, %v187_v13  ;;  %vm186_vm11 = vcmp.eq.f32.partialorder %v185_v16, 8.507059e+37 }
 0x1b3   :  { %v266_v7 = vpop.eup %265 }
 0x1b4   :  { %v268_v8 = vpop.eup %267  ;;  %v175_v9 = vadd.f32 1.0, %v266_v7 }
 0x1b5   :  { %v177_v10 = vmul.f32 %v268_v8, %v174_v6  ;;  %vm182_vm8 = vweird.f32 %v268_v8 }
 0x1b6   :  { %269 = vrcp.f32 %v175_v9  ;;  %vm183_vm10 = vmor %vm181_vm9, %vm182_vm8  ;;  %v202_v28 = vand.u32 2147483648, %v175_v9  ;;  %v200_v31 = vand.u32 2147483647, %v175_v9  ;;  %vm196_vm13 = vweird.f32 %v175_v9 }
 0x1b7   :  { %v178_v11 = vsub.f32 1.0, %v177_v10 }
 0x1b8   :  { %v203_v35 = vor.u32 1.1754944e-38, %v202_v28  ;;  %vm201_vm15 = vcmp.eq.f32.partialorder %v200_v31, 8.507059e+37 }
 0x1b9   :  { %v179_v14 = vmul.f32 %v268_v8, %v178_v11 }
 0x1bb   :  { %v180_v17 = vadd.f32 %v268_v8, %v179_v14 }
 0x1bc   :  { %v270_v18 = vpop.eup %269 }
 0x1bd   :  { %v184_v21 = vsel %vm183_vm10, %v268_v8, %v180_v17  ;;  %v192_v22 = vmul.f32 %v270_v18, %v175_v9  ;;  %vm197_vm12 = vweird.f32 %v270_v18 }
 0x1be   :  { %v189_v24 = vsel %vm186_vm11, %v188_v19, %v184_v21  ;;  %vm198_vm14 = vmor %vm196_vm13, %vm197_vm12 }
 0x1bf   :  { %v206_v25 = vmul.f32 %v189_v24, %v356_v12  ;;  %v193_v26 = vsub.f32 1.0, %v192_v22 }
 0x1c1   :  { %v209_v29 = vmul.f32 %v208_v23, %v206_v25  ;;  %v194_v30 = vmul.f32 %v270_v18, %v193_v26 }
 0x1c3   :  { %v215_v32 = vadd.f32 %v213_v27, %v209_v29  ;;  %v195_v33 = vadd.f32 %v270_v18, %v194_v30 }
 0x1c5   :  { %v246_v36 = vclamps-f32 %v215_v32, 100.0  ;;  %v199_v37 = vsel %vm198_vm14, %v270_v18, %v195_v33 }
 0x1c6   :  { %v204_v38 = vsel %vm201_vm15, %v203_v35, %v199_v37 }
 0x1c7   :  { %v223_v39 = vadd.f32 %v246_v36, %v221_v34  ;;  %v207_v12 = vmul.f32 %v204_v38, %v363_v15 }
 0x1c9   :  { %225 = vst.msk [vmem:[%s405_s8] sm:$0xff] %vm35_vm0, %v223_v39  ;;  %v210_v41 = vmul.f32 %v208_v23, %v207_v12 }
 0x1cb   :  { %v216_v42 = vadd.f32 %v214_v40, %v210_v41 }
 0x1cd   :  { %v247_v44 = vclamps-f32 %v216_v42, 100.0 }
 0x1cf   :  { %v224_v45 = vadd.f32 %v247_v44, %v222_v43 }
 0x1d1   :  { %226 = vst.msk [vmem:[%s405_s8 + $0x8] sm:$0xff] %vm35_vm0, %v224_v45 }

// kernel: byte_transformer_forward.12
= control target key start
LH: loop header
LB: loop body
LE: loop exit
PB: predicated region body
PF: predicated region fallthrough
CT: control target
= control target key end

     0   :  { %vm19_vm0 = vcmask 785408   ;;  %v99_v1 = vmov 0.0   ;;  %vm43_vm1 = vcmask 261120   ;;  %vm79_vm2 = vcmask 781312   ;;  %s145_s1 = inlined_call_operand.vmem [shape: bf16[32,96], index: 1, kind: input, shape index: {}]   ;;  %s146_s0 = inlined_call_operand.vmem [shape: f32[16,32], index: 0, kind: input, shape index: {}]   ;;  %s147_s2 = inlined_call_operand.vmem [shape: f32[1,96], index: 2, kind: input, shape index: {}]   ;;  %s148_s3 = inlined_call_operand.vmem [shape: bf16[16,96], index: 3, kind: output, shape index: {}]  }
   0x1   :  { %v96_v0 = vld [vmem:[%s145_s1 + $0x8] sm:$0xff]  ;;  %20 = vst.msk [vmem:[#allocation2] sm:$0xff] %vm19_vm0, %v99_v1  ;;  %v95_v2 = vld [vmem:[%s145_s1] sm:$0xff] }
   0x2   :  { %21 = vst.msk [vmem:[#allocation2 + $0x8] sm:$0xff] %vm19_vm0, %v99_v1  ;;  %53 = vmatpush.bf16.msra.mxu0 %v96_v0  ;;  %v24_v3 = vld [vmem:[%s146_s0] sm:$0xff]  ;;  %v25_v4 = vld [vmem:[%s146_s0 + $0x8] sm:$0xff] }
   0x3   :  { %v26_v5 = vpack.c.bf16 %v25_v4, %v24_v3  ;;  %v98_v10 = vld [vmem:[%s147_s2] ss:$0 sm:$0xff] }
   0x6   :  { %54 = vmatpush.bf16.msra.mxu0 %v95_v2 }
   0x8   :  { %v22_v6 = vld [vmem:[#allocation2] sm:$0xff] }
   0x9   :  { %94 = vmatmul.msk.bf16.vlgmr.msra.gmra.mxu0 %vm43_vm1, %v26_v5  ;;  %v23_v9 = vld [vmem:[#allocation2 + $0x8] sm:$0xff] }
  0x86   :  { %v56_v7 = vpop.f32.mrf.mxu0 }
  0x87   :  { %v61_v8 = vadd.f32 %v56_v7, %v22_v6 }
  0x89   :  { %64 = vst.msk [vmem:[#allocation2] sm:$0xff] %vm19_vm0, %v61_v8 }
  0x8e   :  { %v58_v11 = vpop.f32.mrf.mxu0 }
  0x8f   :  { %v62_v12 = vadd.f32 %v58_v11, %v23_v9 }
  0x90   :  { %v69_v13 = vld [vmem:[#allocation2] sm:$0xff] }
  0x91   :  { %v75_v14 = vadd.f32 %v98_v10, %v69_v13  ;;  %65 = vst.msk [vmem:[#allocation2 + $0x8] sm:$0xff] %vm19_vm0, %v62_v12 }
  0x93   :  { %v77_v15 = vpack.c.bf16 %v75_v14, %v75_v14 }
  0x95   :  { %80 = vst.msk [vmem:[%s148_s3] sm:$0xf] %vm79_vm2, %v77_v15 }
  0x98   :  { %v70_v16 = vld [vmem:[#allocation2 + $0x8] sm:$0xff] }
  0x99   :  { %v76_v17 = vadd.f32 %v98_v10, %v70_v16 }
  0x9b   :  { %v78_v18 = vpack.c.bf16 %v76_v17, %v76_v17 }
  0x9d   :  { %81 = vst.msk [vmem:[%s148_s3 + $0x4] sm:$0xf] %vm79_vm2, %v78_v18 }

// kernel: byte_transformer_forward.13
= control target key start
LH: loop header
LB: loop body
LE: loop exit
PB: predicated region body
PF: predicated region fallthrough
CT: control target
= control target key end

     0   :  { %7 = vsyncpa [#allocation3], 0  ;;  %s729_s9 = smov 0   ;;  %s731_s10 = smov 0   ;;  %s843_s0 = inlined_call_operand.vmem [shape: f32[4], index: 0, kind: input, shape index: {}]   ;;  %s844_s1 = inlined_call_operand.vmem [shape: bf16[2,8,96], index: 1, kind: input, shape index: {}]   ;;  %s845_s2 = inlined_call_operand.vmem [shape: bf16[2,8,32], index: 2, kind: output, shape index: {}]  }
   0x1   :  { %s733_s11 = smov 0  }
   0x2 LB: > { %s569_s12 = sadd.s32 4294967295, %s697_s11   ;;  %s25_s13 = sadd.s32 1, %s693_s10  ;;  %s697_s11 = sphi %s733_s11, %s13_s11   ;;  %s693_s10 = sphi %s731_s10, %s847_s10   ;;  %s689_s9 = sphi %s729_s9, %s846_s9  }
   0x3   : > { %p27_p0 = scmp.ge.s32.totalorder %s25_s13, 2  ;;  %p571_p1 = scmp.ge.s32.totalorder %s697_s11, 1 }
   0x4   : > { %p105_p2 = scmp.lt.s32.totalorder %s697_s11, 3  ;;  %p599_p4 = scmp.eq.s32.totalorder %s569_s12, 0 }
   0x5   : > { %s849_s13 = smov (%p27_p0, %s25_s13), 0  ;;  %s117_s16 = sshll.u32 %s843_s0, 4  ;;  %s118_s16 = int_to_ptr.vmem [resolvable:$true] %s117_s16 }
   0x6   : > { %p106_p3 = pnand %p571_p1, %p105_p2  ;;  %s699_s17 = smov [#allocation2]  }
   0x8   : > { %p595_p5 = pneg %p106_p3  ;;  %137 = sbr.rel (%p106_p3) target bundleno = 1205 (0x4b5), region = 28 }
   0xa   : > { %p596_p6 = pnand %p599_p4, %p595_p5 }
   0xc   : > { %598 = dma.vmem_to_smem (!%p596_p6), %s118_s16, 16, %s699_s17, [#allocation3]  }
   0xd   : > { %684 = dma.done.wait (%p599_p4), [#allocation3], 16  }
   0xe   : > { %686 = vsyncadd (%p599_p4), [#allocation3], 4294967280 }
   0xf   : > { %144 = sfence }
  0x10   : > { %p162_p7 = scmp.lt.s32.totalorder %s689_s9, 1  ;;  %s700_s22 = smov 96   ;;  %vm193_vm0 = vcmask 64512   ;;  %v175_v16 = vlaneseq  ;;  %vm235_vm3 = vcmask 1043456   ;;  %vm253_vm6 = vcmask 60416  }
  0x11   : > { %s701_s23 = smov 88   ;;  %s702_s24 = smov 120   ;;  %vm329_vm8 = vcmask 126016   ;;  %vm405_vm9 = vcmask 191616   ;;  %vm481_vm10 = vcmask 257216  }
  0x12   : > { %s851_s9 = smov (!%p162_p7, %s689_s9), 1  ;;  %s703_s25 = smov 64   ;;  %v775_v19 = vshrl.u32 %v175_v16, 7  ;;  %v777_v20 = vand.u32 127, %v175_v16 }
  0x13   : > { %s576_s18 = sshll.u32 %s851_s9, 2  ;;  %s213_s26 = sld [smem:[#allocation2]] }
  0x14   : > { %s759_s21 = scalar_lea.vmem %s844_s1, %s576_s18  ;;  %s704_s27 = smov 80   ;;  %vm181_vm1 = vcmp.gt.s32.totalorder %v777_v20, %v775_v19 }
  0x15   : > { %v187_v0 = vld [vmem:[%s759_s21] sm:$0xf]  ;;  %s705_s28 = smov 72   ;;  %s706_s29 = smov 112  }
  0x16   : > { %v189_v1 = vunpack.c.l.b16 %v187_v0  ;;  %v256_v3 = vld [vmem:[%s759_s21] sm:$0xf]  ;;  %s707_s30 = smov 104   ;;  %s581_s3 = sld [smem:[#allocation2 + $0x1]] }
  0x17   : > { %v263_v4 = vunpack.c.l.b16 %v256_v3  ;;  %v186_v8 = vld [vmem:[%s759_s21] sm:$0xf]  ;;  %s587_s4 = sld [smem:[#allocation2 + $0x3]]  ;;  %s708_s5 = smov 56  }
  0x18   : > { %v190_v2 = vpack.c.b16 %v189_v1, %v189_v1  ;;  %v255_v9 = vld [vmem:[%s759_s21] sm:$0xf]  ;;  %s709_s6 = smov 40   ;;  %s814_s12 = scalar_lea.vmem %s845_s2, %s576_s18 }
  0x19   : > { %v763_v5 = vpack.c.b16 %v263_v4, %v263_v4  ;;  %v258_v10 = vunpack.c.l.b16 %v255_v9  ;;  %v332_v12 = vld [vmem:[%s759_s21] sm:$0xf]  ;;  %v214_v22 = vstv %s213_s26  ;;  %s584_s14 = sld [smem:[#allocation2 + $0x2]]  ;;  %s710_s9 = smov 48  }
  0x1a   : > { %191 = vrot.lane.b32.xlu0 %v190_v2, %s700_s22  ;;  %v339_v13 = vunpack.c.l.b16 %v332_v12  ;;  %v408_v18 = vld [vmem:[%s759_s21] sm:$0xf]  ;;  %s711_s15 = smov 8   ;;  %s712_s16 = smov 16  }
  0x1b   : > { %265 = vrot.lane.b32.xlu1 %v763_v5, %s701_s23  ;;  %v259_v11 = vpack.c.b16 %v258_v10, %v258_v10  ;;  %v415_v21 = vunpack.c.l.b16 %v408_v18  ;;  %v331_v26 = vld [vmem:[%s759_s21] sm:$0xf]  ;;  %s713_s17 = smov 24  }
  0x1c   : > { %v772_v17 = vpack.c.b16 %v339_v13, %v339_v13  ;;  %v334_v29 = vunpack.c.l.b16 %v331_v26  ;;  %v407_v32 = vld [vmem:[%s759_s21] sm:$0xf]  ;;  %v287_v49 = vstv %s581_s3 }
  0x1d   : > { %260 = vrot.lane.b32.xlu2 %v259_v11, %s702_s24  ;;  %v782_v24 = vpack.c.b16 %v415_v21, %v415_v21  ;;  %v410_v33 = vunpack.c.l.b16 %v407_v32  ;;  %v439_v55 = vstv %s587_s4 }
  0x1e   : > { %v335_v31 = vpack.c.b16 %v334_v29, %v334_v29 }
  0x1f   : > { %v411_v34 = vpack.c.b16 %v410_v33, %v410_v33 }
  0x25   : > { %230 = vrot.lane.b32.xlu2 %v190_v2, %s703_s25 }
  0x2d   : > { %341 = vrot.lane.b32.xlu2 %v772_v17, %s704_s27 }
  0x35   : > { %417 = vrot.lane.b32.xlu2 %v782_v24, %s705_s28 }
  0x3d   : > { %336 = vrot.lane.b32.xlu2 %v335_v31, %s706_s29 }
  0x45   : > { %412 = vrot.lane.b32.xlu2 %v411_v34, %s707_s30 }
  0x77   : > { %v261_v35 = vpop.permute.xlu2 %260 }
  0x7f   : > { %v231_v36 = vpop.permute.xlu2 %230 }
  0x80   : > { %v237_v40 = vsel %vm235_vm3, %v231_v36, 0 }
  0x81   : > { %246 = vmatpush.bf16.msra.mxu1 %v237_v40 }
  0x87   : > { %v342_v37 = vpop.permute.xlu2 %341 }
  0x88   : > { %v347_v48 = vsel %vm193_vm0, %v342_v37, 0 }
  0x89   : > { %356 = vmatpush.bf16.xpose.msrb.mxu1 %v347_v48 }
  0x8c   : > { %v192_v6 = vpop.permute.xlu0 %191 }
  0x8d   : > { %v198_v7 = vsel %vm193_vm0, %v192_v6, 0  ;;  %v266_v14 = vpop.permute.xlu1 %265 }
  0x8e   : > { %207 = vmatpush.bf16.xpose.msra.mxu0 %v198_v7  ;;  %v271_v15 = vsel %vm193_vm0, %v266_v14, 0  ;;  %v363_v7 = vstv %s584_s14 }
  0x8f   : > { %280 = vmatpush.bf16.xpose.msra.mxu2 %v271_v15  ;;  %v418_v38 = vpop.permute.xlu2 %417 }
  0x90   : > { %v423_v39 = vsel %vm193_vm0, %v418_v38, 0 }
  0x95   : > { %578 = vmatmul.msk.bf16.vlgmr.msra.gmra.mxu0 %vm193_vm0, %v186_v8 }
  0x96   : > { %580 = vmatmul.msk.bf16.vlgmr.msra.gmra.mxu2 %vm193_vm0, %v261_v35  ;;  %432 = vmatpush.bf16.xpose.msrb.mxu0 %v423_v39 }
  0x97   : > { %v337_v41 = vpop.permute.xlu2 %336 }
  0x9f   : > { %v413_v42 = vpop.permute.xlu2 %412 }
  0xa5   : > { %586 = vmatmul.msk.bf16.vlgmr.msrb.gmra.mxu0 %vm193_vm0, %v413_v42 }
 0x112   : > { %v209_v23 = vpop.f32.mrf.mxu0 }
 0x113   : > { %vm215_vm2 = vcmp.lt.f32.partialorder %v209_v23, %v214_v22 }
 0x114   : > { %v216_v25 = vsel %vm215_vm2, -10000.0, %v209_v23 }
 0x115   : > { %v217_v27 = vsel %vm181_vm1, -inf, %v216_v25 }
 0x116   : > { %v218_v28 = vsel %vm193_vm0, %v217_v27, -inf }
 0x117   : > { %219 = vmax.xlane.f32.xlu0 %v218_v28 }
 0x119   : > { %v282_v50 = vpop.f32.mrf.mxu2 }
 0x11a   : > { %v211_v30 = vpop.f32.mrf.mxu0  ;;  %vm288_vm4 = vcmp.lt.f32.partialorder %v282_v50, %v287_v49 }
 0x11b   : > { %v289_v51 = vsel %vm288_vm4, -10000.0, %v282_v50 }
 0x11c   : > { %v290_v52 = vsel %vm181_vm1, -inf, %v289_v51 }
 0x11d   : > { %v291_v53 = vsel %vm193_vm0, %v290_v52, -inf }
 0x11e   : > { %292 = vmax.xlane.f32.xlu2 %v291_v53 }
 0x121   : > { %v284_v54 = vpop.f32.mrf.mxu2 }
 0x122   : > { %v434_v56 = vpop.f32.mrf.mxu0 }
 0x123   : > { %vm440_vm5 = vcmp.lt.f32.partialorder %v434_v56, %v439_v55 }
 0x124   : > { %v441_v57 = vsel %vm440_vm5, -10000.0, %v434_v56 }
 0x125   : > { %v442_v58 = vsel %vm181_vm1, -inf, %v441_v57 }
 0x126   : > { %v443_v59 = vsel %vm193_vm0, %v442_v58, -inf }
 0x12a   : > { %v436_v61 = vpop.f32.mrf.mxu0 }
 0x18a   : > { %v220_v43 = vpop.xlane.xlu0 %219 }
 0x18b   : > { %v221_v44 = vsub.f32 %v217_v27, %v220_v43 }
 0x18d   : > { %v222_v45 = vmul.f32 1.442695, %v221_v44 }
 0x18f   : > { %640 = vpow2.f32 %v222_v45 }
 0x191   : > { %v293_v3 = vpop.xlane.xlu2 %292 }
 0x192   : > { %v294_v6 = vsub.f32 %v290_v52, %v293_v3 }
 0x195   : > { %v641_v46 = vpop.eup %640 }
 0x196   : > { %v224_v47 = vsel %vm193_vm0, %v641_v46, 0.0 }
 0x197   : > { %225 = vadd.xlane.f32.xlu1 %v224_v47 }
 0x19f   : > { %444 = vmax.xlane.f32.xlu1 %v443_v59 }
 0x1b8   : > { %303 = vrot.lane.b32.xlu1 %v763_v5, %s708_s5  ;;  %v295_v5 = vmul.f32 1.442695, %v294_v6 }
 0x1c0   : > { %455 = vrot.lane.b32.xlu1 %v782_v24, %s709_s6 }
 0x20a   : > { %v226_v60 = vpop.xlane.xlu1 %225 }
 0x20b   : > { %642 = vrcp.f32 %v226_v60 }
 0x20c   : > { %644 = vpow2.f32 %v295_v5 }
 0x211   : > { %v643_v62 = vpop.eup %642 }
 0x212   : > { %v228_v63 = vmul.f32 %v643_v62, %v641_v46  ;;  %v445_v8 = vpop.xlane.xlu1 %444  ;;  %v645_v16 = vpop.eup %644 }
 0x213   : > { %v446_v11 = vsub.f32 %v442_v58, %v445_v8  ;;  %v297_v18 = vsel %vm193_vm0, %v645_v16, 0.0 }
 0x214   : > { %v229_v0 = vpack.c.bf16 %v228_v63, %v228_v63 }
 0x215   : > { %v447_v14 = vmul.f32 1.442695, %v446_v11 }
 0x216   : > { %579 = vmatmul.msk.bf16.vlgmr.msra.gmra.mxu1 %vm193_vm0, %v229_v0 }
 0x217   : > { %646 = vpow2.f32 %v447_v14 }
 0x21d   : > { %v647_v21 = vpop.eup %646 }
 0x21e   : > { %v449_v22 = vsel %vm193_vm0, %v647_v21, 0.0 }
 0x226   : > { %583 = vmatmul.msk.bf16.vlgmr.msrb.gmra.mxu1 %vm193_vm0, %v337_v41 }
 0x22a   : > { %v304_v23 = vpop.permute.xlu1 %303 }
 0x22b   : > { %v309_v24 = vsel %vm235_vm3, %v304_v23, 0 }
 0x22c   : > { %318 = vmatpush.bf16.msra.mxu3 %v309_v24 }
 0x232   : > { %v456_v19 = vpop.permute.xlu1 %455 }
 0x233   : > { %v461_v20 = vsel %vm235_vm3, %v456_v19, 0 }
 0x234   : > { %470 = vmatpush.bf16.msrb.mxu2 %v461_v20 }
 0x293   : > { %v248_v1 = vpop.f32.mrf.mxu1 }
 0x294   : > { %v252_v2 = vpack.c.bf16 %v248_v1, %v248_v1 }
 0x296   : > { %254 = vst.msk [vmem:[%s814_s12] sm:$0xf] %vm253_vm6, %v252_v2 }
 0x29b   : > { %v250_v4 = vpop.f32.mrf.mxu1 }
 0x2a3   : > { %v358_v9 = vpop.f32.mrf.mxu1 }
 0x2a4   : > { %vm364_vm7 = vcmp.lt.f32.partialorder %v358_v9, %v363_v7 }
 0x2a5   : > { %v365_v10 = vsel %vm364_vm7, -10000.0, %v358_v9 }
 0x2a6   : > { %v366_v12 = vsel %vm181_vm1, -inf, %v365_v10 }
 0x2a7   : > { %v367_v13 = vsel %vm193_vm0, %v366_v12, -inf }
 0x2a8   : > { %368 = vmax.xlane.f32.xlu0 %v367_v13 }
 0x2ab   : > { %v360_v15 = vpop.f32.mrf.mxu1 }
 0x2b0   : > { %298 = vadd.xlane.f32.xlu0 %v297_v18 }
 0x2b8   : > { %450 = vadd.xlane.f32.xlu0 %v449_v22 }
 0x31b   : > { %v369_v25 = vpop.xlane.xlu0 %368 }
 0x31c   : > { %v370_v26 = vsub.f32 %v366_v12, %v369_v25 }
 0x31e   : > { %v371_v27 = vmul.f32 1.442695, %v370_v26 }
 0x320   : > { %648 = vpow2.f32 %v371_v27 }
 0x323   : > { %v299_v28 = vpop.xlane.xlu0 %298 }
 0x324   : > { %650 = vrcp.f32 %v299_v28 }
 0x326   : > { %v649_v29 = vpop.eup %648 }
 0x327   : > { %v373_v30 = vsel %vm193_vm0, %v649_v29, 0.0 }
 0x328   : > { %374 = vadd.xlane.f32.xlu0 %v373_v30 }
 0x32a   : > { %v651_v31 = vpop.eup %650 }
 0x32b   : > { %v451_v32 = vpop.xlane.xlu0 %450  ;;  %v301_v33 = vmul.f32 %v651_v31, %v645_v16 }
 0x32c   : > { %652 = vrcp.f32 %v451_v32 }
 0x32d   : > { %v302_v34 = vpack.c.bf16 %v301_v33, %v301_v33 }
 0x32f   : > { %582 = vmatmul.msk.bf16.vlgmr.msra.gmra.mxu3 %vm193_vm0, %v302_v34 }
 0x332   : > { %v653_v35 = vpop.eup %652 }
 0x333   : > { %v453_v36 = vmul.f32 %v653_v35, %v647_v21 }
 0x335   : > { %v454_v37 = vpack.c.bf16 %v453_v36, %v453_v36 }
 0x337   : > { %588 = vmatmul.msk.bf16.vlgmr.msrb.gmra.mxu2 %vm193_vm0, %v454_v37 }
 0x33c   : > { %379 = vrot.lane.b32.xlu0 %v772_v17, %s710_s9 }
 0x39b   : > { %v375_v38 = vpop.xlane.xlu0 %374 }
 0x39c   : > { %654 = vrcp.f32 %v375_v38 }
 0x3a2   : > { %v655_v39 = vpop.eup %654 }
 0x3a3   : > { %v377_v40 = vmul.f32 %v655_v39, %v649_v29 }
 0x3a5   : > { %v378_v43 = vpack.c.bf16 %v377_v40, %v377_v40 }
 0x3ae   : > { %v380_v41 = vpop.permute.xlu0 %379 }
 0x3af   : > { %v385_v42 = vsel %vm235_vm3, %v380_v41, 0 }
 0x3b0   : > { %394 = vmatpush.bf16.msrb.mxu3 %v385_v42 }
 0x3b2   : > { %v320_v44 = vpop.f32.mrf.mxu3 }
 0x3b3   : > { %v324_v45 = vpack.c.bf16 %v320_v44, %v320_v44  ;;  %585 = vmatmul.msk.bf16.vlgmr.msrb.gmra.mxu3 %vm193_vm0, %v378_v43 }
 0x3b5   : > { %326 = vrot.lane.b32.xlu2 %v324_v45, %s711_s15 }
 0x3ba   : > { %v322_v46 = vpop.f32.mrf.mxu3  ;;  %v472_v47 = vpop.f32.mrf.mxu2 }
 0x3bb   : > { %v476_v52 = vpack.c.bf16 %v472_v47, %v472_v47 }
 0x3c2   : > { %v474_v17 = vpop.f32.mrf.mxu2 }
 0x40f   : > { %v327_v48 = vpop.permute.xlu2 %326 }
 0x410   : > { %330 = vst.msk [vmem:[%s814_s12] sm:$0xf] %vm329_vm8, %v327_v48 }
 0x436   : > { %v396_v49 = vpop.f32.mrf.mxu3 }
 0x437   : > { %v400_v50 = vpack.c.bf16 %v396_v49, %v396_v49 }
 0x439   : > { %402 = vrot.lane.b32.xlu1 %v400_v50, %s712_s16 }
 0x43e   : > { %v398_v51 = vpop.f32.mrf.mxu3 }
 0x441   : > { %478 = vrot.lane.b32.xlu1 %v476_v52, %s713_s17 }
 0x4ab   : > { %v403_v53 = vpop.permute.xlu1 %402 }
 0x4ac   : > { %406 = vst.msk [vmem:[%s814_s12] sm:$0xf] %vm405_vm9, %v403_v53 }
 0x4b3   : > { %v479_v54 = vpop.permute.xlu1 %478 }
 0x4b4   : > { %482 = vst.msk [vmem:[%s814_s12] sm:$0xf] %vm481_vm10, %v479_v54 }
 0x4b5 PF: > { %s13_s11 = sadd.s32 1, %s697_s11   ;;  %s846_s9 = smov %s693_s10 }
 0x4b6   : > { %p10_p8 = scmp.ge.s32.totalorder %s13_s11, 4   ;;  %s847_s10 = smov %s849_s13 }
 0x4b8   :  { %12 = sbr.rel (!%p10_p8) target bundleno = 2 (0x2), region = 64 }
 0x4bd   :  { %508 = vsyncpa [#allocation3], 1 }
 0x4be   :  { %510 = vsyncpa [#allocation3 + $0x1], 1 }

// kernel: byte_transformer_forward.15
= control target key start
LH: loop header
LB: loop body
LE: loop exit
PB: predicated region body
PF: predicated region fallthrough
CT: control target
= control target key end

     0   :  { %vm55_vm0 = vcmask 261120   ;;  %v345_v10 = vmov 128.0   ;;  %s454_s2 = inlined_call_operand.vmem [shape: bf16[32,128], index: 2, kind: input, shape index: {}]   ;;  %s455_s1 = inlined_call_operand.vmem [shape: f32[16,32], index: 1, kind: input, shape index: {}]   ;;  %s456_s3 = inlined_call_operand.vmem [shape: f32[1,128], index: 3, kind: input, shape index: {}]   ;;  %s457_s4 = inlined_call_operand.vmem [shape: f32[1,128], index: 4, kind: input, shape index: {}]   ;;  %s458_s5 = inlined_call_operand.vmem [shape: f32[1,128], index: 5, kind: input, shape index: {}]   ;;  %s459_s6 = inlined_call_operand.vmem [shape: f32[1,128], index: 6, kind: input, shape index: {}]   ;;  %s460_s0 = inlined_call_operand.<no memory space> [shape: f32[1], index: 0, kind: input, shape index: {}]   ;;  %s461_s7 = inlined_call_operand.vmem [shape: bf16[16,128], index: 7, kind: output, shape index: {}]  }
   0x1   :  { %v311_v0 = vld [vmem:[%s454_s2 + $0x8] sm:$0xff]  ;;  %v310_v1 = vld [vmem:[%s454_s2] sm:$0xff]  ;;  %323 = vrcp.f32 %v345_v10 }
   0x2   :  { %65 = vmatpush.bf16.msra.mxu0 %v311_v0  ;;  %v36_v2 = vld [vmem:[%s455_s1] sm:$0xff]  ;;  %v37_v3 = vld [vmem:[%s455_s1 + $0x8] sm:$0xff] }
   0x3   :  { %v38_v4 = vpack.c.bf16 %v37_v3, %v36_v2  ;;  %v319_v5 = vld [vmem:[%s456_s3] ss:$0 sm:$0xff] }
   0x4   :  { %v320_v39 = vld [vmem:[%s457_s4] ss:$0 sm:$0xff] }
   0x5   :  { %v321_v42 = vld [vmem:[%s458_s5] ss:$0 sm:$0xff] }
   0x6   :  { %66 = vmatpush.bf16.msra.mxu0 %v310_v1  ;;  %v322_v47 = vld [vmem:[%s459_s6] ss:$0 sm:$0xff]  ;;  %s199_s6 = ssub.f32 1.0, %s460_s0 }
   0x7   :  { %v324_v11 = vpop.eup %323 }
   0x8   :  { %v97_v12 = vmul.f32 128.0, %v324_v11  ;;  %vm101_vm1 = vweird.f32 %v324_v11 }
   0x9   :  { %305 = vmatmul.msk.bf16.vlgmr.msra.gmra.mxu0 %vm55_vm0, %v38_v4 }
   0xa   :  { %v98_v13 = vsub.f32 1.0, %v97_v12 }
   0xc   :  { %v99_v14 = vmul.f32 %v324_v11, %v98_v13 }
   0xe   :  { %v100_v15 = vadd.f32 %v324_v11, %v99_v14  ;;  %v196_v14 = vstv %s460_s0 }
  0x10   :  { %v102_v16 = vsel %vm101_vm1, %v324_v11, %v100_v15  ;;  %v200_v11 = vstv %s199_s6 }
  0x86   :  { %v68_v6 = vpop.f32.mrf.mxu0 }
  0x87   :  { %v402_v7 = vadd.f32 %v319_v5, %v68_v6 }
  0x89   :  { %92 = vadd.xlane.f32.xlu0 %v402_v7 }
  0x8e   :  { %v70_v8 = vpop.f32.mrf.mxu0 }
  0x8f   :  { %v405_v9 = vadd.f32 %v319_v5, %v70_v8 }
  0x91   :  { %94 = vadd.xlane.f32.xlu0 %v405_v9 }
  0xfc   :  { %v93_v17 = vpop.xlane.xlu0 %92 }
  0xfd   :  { %v103_v18 = vmul.f32 %v102_v16, %v93_v17 }
  0xff   :  { %v105_v19 = vsub.f32 %v402_v7, %v103_v18  ;;  %v201_v18 = vmul.f32 %v200_v11, %v402_v7 }
 0x101   :  { %v107_v20 = vmul.f32 %v105_v19, %v105_v19 }
 0x103   :  { %109 = vadd.xlane.f32.xlu1 %v107_v20 }
 0x104   :  { %v95_v21 = vpop.xlane.xlu0 %94 }
 0x105   :  { %v104_v22 = vmul.f32 %v102_v16, %v95_v21 }
 0x107   :  { %v106_v23 = vsub.f32 %v405_v9, %v104_v22 }
 0x109   :  { %v108_v24 = vmul.f32 %v106_v23, %v106_v23 }
 0x10b   :  { %111 = vadd.xlane.f32.xlu1 %v108_v24 }
 0x176   :  { %v110_v25 = vpop.xlane.xlu1 %109 }
 0x177   :  { %v113_v26 = vmul.f32 %v110_v25, %v102_v16 }
 0x179   :  { %v115_v27 = vadd.f32 1e-05, %v113_v26 }
 0x17b   :  { %325 = vrsqrt.f32 %v115_v27  ;;  %vm123_vm3 = vweird.f32 %v115_v27 }
 0x17e   :  { %v112_v28 = vpop.xlane.xlu1 %111 }
 0x17f   :  { %v114_v29 = vmul.f32 %v112_v28, %v102_v16 }
 0x181   :  { %v326_v30 = vpop.eup %325  ;;  %v116_v31 = vadd.f32 1e-05, %v114_v29 }
 0x182   :  { %v118_v32 = vmul.f32 %v326_v30, %v115_v27  ;;  %vm124_vm2 = vweird.f32 %v326_v30 }
 0x183   :  { %327 = vrsqrt.f32 %v116_v31  ;;  %vm125_vm4 = vmor %vm123_vm3, %vm124_vm2  ;;  %vm133_vm6 = vweird.f32 %v116_v31 }
 0x184   :  { %v119_v33 = vmul.f32 %v326_v30, %v118_v32 }
 0x186   :  { %v120_v34 = vmul.f32 0.5, %v119_v33 }
 0x188   :  { %v121_v35 = vsub.f32 1.5, %v120_v34 }
 0x189   :  { %v328_v36 = vpop.eup %327 }
 0x18a   :  { %v122_v37 = vmul.f32 %v326_v30, %v121_v35  ;;  %v128_v38 = vmul.f32 %v328_v36, %v116_v31  ;;  %vm134_vm5 = vweird.f32 %v328_v36 }
 0x18b   :  { %vm135_vm7 = vmor %vm133_vm6, %vm134_vm5 }
 0x18c   :  { %v126_v40 = vsel %vm125_vm4, %v326_v30, %v122_v37  ;;  %v129_v41 = vmul.f32 %v328_v36, %v128_v38  ;;  %v202_v30 = vmul.f32 %v200_v11, %v405_v9 }
 0x18d   :  { %v137_v43 = vmul.f32 %v126_v40, %v105_v19 }
 0x18e   :  { %v130_v44 = vmul.f32 0.5, %v129_v41 }
 0x18f   :  { %v142_v45 = vmul.f32 %v320_v39, %v137_v43 }
 0x190   :  { %v131_v46 = vsub.f32 1.5, %v130_v44 }
 0x191   :  { %v147_v48 = vadd.f32 %v321_v42, %v142_v45 }
 0x192   :  { %v132_v49 = vmul.f32 %v328_v36, %v131_v46 }
 0x193   :  { %v149_v50 = vand.u32 2147483647, %v147_v48 }
 0x194   :  { %v136_v51 = vsel %vm135_vm7, %v328_v36, %v132_v49 }
 0x195   :  { %v154_v52 = vsub.f32 %v149_v50, %v322_v47  ;;  %v138_v53 = vmul.f32 %v136_v51, %v106_v23 }
 0x197   :  { %v306_v54 = vmul.f32 -1.442695, %v154_v52  ;;  %v143_v55 = vmul.f32 %v320_v39, %v138_v53 }
 0x199   :  { %329 = vpow2.f32 %v306_v54  ;;  %v148_v56 = vadd.f32 %v321_v42, %v143_v55 }
 0x19b   :  { %v150_v57 = vand.u32 2147483647, %v148_v56 }
 0x19d   :  { %v155_v58 = vsub.f32 %v150_v57, %v322_v47 }
 0x19f   :  { %v330_v59 = vpop.eup %329  ;;  %v307_v60 = vmul.f32 -1.442695, %v155_v58 }
 0x1a0   :  { %v162_v61 = vadd.f32 1.0, %v330_v59 }
 0x1a1   :  { %331 = vpow2.f32 %v307_v60 }
 0x1a2   :  { %333 = vrcp.f32 %v162_v61  ;;  %v175_v3 = vand.u32 2147483648, %v162_v61  ;;  %v173_v5 = vand.u32 2147483647, %v162_v61  ;;  %vm169_vm9 = vweird.f32 %v162_v61 }
 0x1a4   :  { %v176_v10 = vor.u32 1.1754944e-38, %v175_v3  ;;  %vm174_vm11 = vcmp.eq.f32.partialorder %v173_v5, 8.507059e+37 }
 0x1a7   :  { %v332_v62 = vpop.eup %331 }
 0x1a8   :  { %v334_v63 = vpop.eup %333  ;;  %v163_v0 = vadd.f32 1.0, %v332_v62 }
 0x1a9   :  { %v165_v1 = vmul.f32 %v334_v63, %v162_v61  ;;  %vm170_vm8 = vweird.f32 %v334_v63 }
 0x1aa   :  { %335 = vrcp.f32 %v163_v0  ;;  %vm171_vm10 = vmor %vm169_vm9, %vm170_vm8  ;;  %v190_v19 = vand.u32 2147483648, %v163_v0  ;;  %v188_v22 = vand.u32 2147483647, %v163_v0  ;;  %vm184_vm13 = vweird.f32 %v163_v0 }
 0x1ab   :  { %v166_v2 = vsub.f32 1.0, %v165_v1 }
 0x1ac   :  { %v191_v25 = vor.u32 1.1754944e-38, %v190_v19  ;;  %vm189_vm15 = vcmp.eq.f32.partialorder %v188_v22, 8.507059e+37 }
 0x1ad   :  { %v167_v4 = vmul.f32 %v334_v63, %v166_v2 }
 0x1af   :  { %v168_v6 = vadd.f32 %v334_v63, %v167_v4 }
 0x1b0   :  { %v336_v8 = vpop.eup %335 }
 0x1b1   :  { %v172_v12 = vsel %vm171_vm10, %v334_v63, %v168_v6  ;;  %v180_v13 = vmul.f32 %v336_v8, %v163_v0  ;;  %vm185_vm12 = vweird.f32 %v336_v8 }
 0x1b2   :  { %v177_v15 = vsel %vm174_vm11, %v176_v10, %v172_v12  ;;  %vm186_vm14 = vmor %vm184_vm13, %vm185_vm12 }
 0x1b3   :  { %v194_v16 = vmul.f32 %v177_v15, %v402_v7  ;;  %v181_v17 = vsub.f32 1.0, %v180_v13 }
 0x1b5   :  { %v197_v20 = vmul.f32 %v196_v14, %v194_v16  ;;  %v182_v21 = vmul.f32 %v336_v8, %v181_v17 }
 0x1b7   :  { %v427_v23 = vadd.f32 %v201_v18, %v197_v20  ;;  %v183_v24 = vadd.f32 %v336_v8, %v182_v21 }
 0x1b9   :  { %v308_v26 = vclamps-f32 %v427_v23, 100.0  ;;  %v187_v27 = vsel %vm186_vm14, %v336_v8, %v183_v24 }
 0x1ba   :  { %v192_v28 = vsel %vm189_vm15, %v191_v25, %v187_v27 }
 0x1bb   :  { %v432_v29 = vmul.f32 0.70710677, %v308_v26  ;;  %v195_v7 = vmul.f32 %v192_v28, %v405_v9  ;;  %v346_v28 = vmov -1.0  }
 0x1bd   :  { %v217_v31 = vand.u32 2147483647, %v432_v29  ;;  %v198_v32 = vmul.f32 %v196_v14, %v195_v7  ;;  %vm213_vm8 = vcmp.ge.f32.partialorder %v432_v29, 0.0 }
 0x1be   :  { %v215_v7 = vsel %vm213_vm8, 1.0, %v346_v28 }
 0x1bf   :  { %v219_v33 = vmul.f32 0.3275911, %v217_v31  ;;  %v437_v34 = vadd.f32 %v202_v30, %v198_v32  ;;  %v271_v53 = vsub.f32 0.0, %v217_v31 }
 0x1c1   :  { %v221_v35 = vadd.f32 1.0, %v219_v33  ;;  %v309_v36 = vclamps-f32 %v437_v34, 100.0  ;;  %v273_v60 = vmul.f32 %v271_v53, %v217_v31 }
 0x1c3   :  { %337 = vrcp.f32 %v221_v35  ;;  %v442_v37 = vmul.f32 0.70710677, %v309_v36  ;;  %v234_v43 = vand.u32 2147483648, %v221_v35  ;;  %v232_v45 = vand.u32 2147483647, %v221_v35 }
 0x1c4   :  { %vm228_vm1 = vweird.f32 %v221_v35  ;;  %v275_v2 = vmul.f32 1.442695, %v273_v60  ;;  %v210_v29 = vmul.f32 0.5, %v309_v36 }
 0x1c5   :  { %v218_v38 = vand.u32 2147483647, %v442_v37  ;;  %v235_v47 = vor.u32 1.1754944e-38, %v234_v43  ;;  %vm233_vm3 = vcmp.eq.f32.partialorder %v232_v45, 8.507059e+37  ;;  %vm214_vm9 = vcmp.ge.f32.partialorder %v442_v37, 0.0 }
 0x1c6   :  { %v216_v33 = vsel %vm214_vm9, 1.0, %v346_v28 }
 0x1c7   :  { %v220_v39 = vmul.f32 0.3275911, %v218_v38  ;;  %v272_v4 = vsub.f32 0.0, %v218_v38 }
 0x1c9   :  { %v338_v40 = vpop.eup %337  ;;  %v222_v9 = vadd.f32 1.0, %v220_v39  ;;  %v274_v11 = vmul.f32 %v272_v4, %v218_v38  ;;  %v209_v39 = vmul.f32 0.5, %v308_v26 }
 0x1ca   :  { %v224_v41 = vmul.f32 %v338_v40, %v221_v35  ;;  %vm229_vm0 = vweird.f32 %v338_v40 }
 0x1cb   :  { %339 = vrcp.f32 %v222_v9  ;;  %vm230_vm2 = vmor %vm228_vm1, %vm229_vm0  ;;  %v249_v56 = vand.u32 2147483648, %v222_v9  ;;  %v247_v58 = vand.u32 2147483647, %v222_v9  ;;  %vm243_vm5 = vweird.f32 %v222_v9 }
 0x1cc   :  { %v225_v42 = vsub.f32 1.0, %v224_v41  ;;  %341 = vpow2.f32 %v275_v2  ;;  %v277_v16 = vmul.f32 1.442695, %v274_v11 }
 0x1cd   :  { %v250_v63 = vor.u32 1.1754944e-38, %v249_v56  ;;  %vm248_vm7 = vcmp.eq.f32.partialorder %v247_v58, 8.507059e+37 }
 0x1ce   :  { %v226_v44 = vmul.f32 %v338_v40, %v225_v42  ;;  %343 = vpow2.f32 %v277_v16 }
 0x1d0   :  { %v227_v46 = vadd.f32 %v338_v40, %v226_v44 }
 0x1d1   :  { %v340_v48 = vpop.eup %339 }
 0x1d2   :  { %v231_v49 = vsel %vm230_vm2, %v338_v40, %v227_v46  ;;  %v239_v51 = vmul.f32 %v340_v48, %v222_v9  ;;  %vm244_vm4 = vweird.f32 %v340_v48  ;;  %v342_v18 = vpop.eup %341 }
 0x1d3   :  { %v236_v50 = vsel %vm233_vm3, %v235_v47, %v231_v49  ;;  %vm245_vm6 = vmor %vm243_vm5, %vm244_vm4 }
 0x1d4   :  { %v253_v52 = vmul.f32 1.0614054, %v236_v50  ;;  %v240_v54 = vsub.f32 1.0, %v239_v51  ;;  %v344_v27 = vpop.eup %343 }
 0x1d6   :  { %v255_v55 = vadd.f32 -1.4531521, %v253_v52  ;;  %v241_v57 = vmul.f32 %v340_v48, %v240_v54 }
 0x1d8   :  { %v257_v59 = vmul.f32 %v255_v55, %v236_v50  ;;  %v242_v61 = vadd.f32 %v340_v48, %v241_v57 }
 0x1da   :  { %v259_v62 = vadd.f32 1.4214138, %v257_v59  ;;  %v246_v0 = vsel %vm245_vm6, %v340_v48, %v242_v61 }
 0x1db   :  { %v251_v3 = vsel %vm248_vm7, %v250_v63, %v246_v0 }
 0x1dc   :  { %v261_v1 = vmul.f32 %v259_v62, %v236_v50  ;;  %v254_v5 = vmul.f32 1.0614054, %v251_v3 }
 0x1de   :  { %v263_v6 = vadd.f32 -0.28449672, %v261_v1  ;;  %v256_v8 = vadd.f32 -1.4531521, %v254_v5 }
 0x1e0   :  { %v265_v10 = vmul.f32 %v263_v6, %v236_v50  ;;  %v258_v12 = vmul.f32 %v256_v8, %v251_v3 }
 0x1e2   :  { %v267_v13 = vadd.f32 0.2548296, %v265_v10  ;;  %v260_v14 = vadd.f32 1.4214138, %v258_v12 }
 0x1e4   :  { %v269_v15 = vmul.f32 %v267_v13, %v236_v50  ;;  %v262_v17 = vmul.f32 %v260_v14, %v251_v3 }
 0x1e6   :  { %v279_v19 = vmul.f32 %v342_v18, %v269_v15  ;;  %v264_v20 = vadd.f32 -0.28449672, %v262_v17 }
 0x1e8   :  { %v266_v21 = vmul.f32 %v264_v20, %v251_v3  ;;  %v281_v22 = vsub.f32 1.0, %v279_v19 }
 0x1ea   :  { %v268_v24 = vadd.f32 0.2548296, %v266_v21  ;;  %v283_v30 = vmul.f32 %v281_v22, %v215_v7 }
 0x1ec   :  { %v270_v25 = vmul.f32 %v268_v24, %v251_v3  ;;  %v285_v35 = vadd.f32 1.0, %v283_v30 }
 0x1ee   :  { %v280_v31 = vmul.f32 %v344_v27, %v270_v25  ;;  %v287_v41 = vmul.f32 %v285_v35, %v209_v39 }
 0x1f0   :  { %v282_v32 = vsub.f32 1.0, %v280_v31 }
 0x1f2   :  { %v284_v38 = vmul.f32 %v282_v32, %v216_v33 }
 0x1f4   :  { %v286_v40 = vadd.f32 1.0, %v284_v38 }
 0x1f6   :  { %v288_v9 = vmul.f32 %v286_v40, %v210_v29 }
 0x1f8   :  { %v315_v42 = vpack.c.bf16 %v288_v9, %v287_v41 }
 0x1fa   :  { %316 = vst [vmem:[%s461_s7] sm:$0xff] %v315_v42  }

// kernel: byte_transformer_forward.16
= control target key start
LH: loop header
LB: loop body
LE: loop exit
PB: predicated region body
PF: predicated region fallthrough
CT: control target
= control target key end

     0   :  { %vm34_vm0 = vcmask 261120   ;;  %v345_v2 = vmov 0.0   ;;  %v346_v23 = vmov 32.0   ;;  %s495_s2 = inlined_call_operand.vmem [shape: bf16[128,32], index: 2, kind: input, shape index: {}]   ;;  %s496_s8 = inlined_call_operand.vmem [shape: f32[16,32], index: 8, kind: output, shape index: {}]   ;;  %s497_s1 = inlined_call_operand.vmem [shape: bf16[16,128], index: 1, kind: input, shape index: {}]   ;;  %s498_s3 = inlined_call_operand.vmem [shape: f32[1,32], index: 3, kind: input, shape index: {}]   ;;  %s499_s4 = inlined_call_operand.vmem [shape: f32[1,32], index: 4, kind: input, shape index: {}]   ;;  %s500_s5 = inlined_call_operand.vmem [shape: f32[1,32], index: 5, kind: input, shape index: {}]   ;;  %s501_s6 = inlined_call_operand.vmem [shape: f32[1,32], index: 6, kind: input, shape index: {}]   ;;  %s502_s0 = inlined_call_operand.<no memory space> [shape: f32[1], index: 0, kind: input, shape index: {}]   ;;  %s503_s7 = inlined_call_operand.vmem [shape: f32[16,32], index: 7, kind: input, shape index: {}]  }
   0x1   :  { %v324_v0 = vld [vmem:[%s495_s2 + $0x38] sm:$0xff]  ;;  %v323_v1 = vld [vmem:[%s495_s2 + $0x30] sm:$0xff]  ;;  %35 = vst.msk [vmem:[%s496_s8] sm:$0xff] %vm34_vm0, %v345_v2  ;;  %v322_v3 = vld [vmem:[%s495_s2 + $0x28] sm:$0xff]  ;;  %331 = vrcp.f32 %v346_v23 }
   0x2   :  { %111 = vmatpush.bf16.msra.mxu0 %v324_v0  ;;  %36 = vst.msk [vmem:[%s496_s8 + $0x8] sm:$0xff] %vm34_vm0, %v345_v2  ;;  %v321_v4 = vld [vmem:[%s495_s2 + $0x20] sm:$0xff]  ;;  %v320_v5 = vld [vmem:[%s495_s2 + $0x18] sm:$0xff]  ;;  %v319_v6 = vld [vmem:[%s495_s2 + $0x10] sm:$0xff] }
   0x3   :  { %v318_v7 = vld [vmem:[%s495_s2 + $0x8] sm:$0xff]  ;;  %v317_v8 = vld [vmem:[%s495_s2] sm:$0xff] }
   0x4   :  { %v316_v9 = vld [vmem:[%s497_s1] sm:$0xff] }
   0x5   :  { %v327_v14 = vld [vmem:[%s498_s3] ss:$0 sm:$0xff] }
   0x6   :  { %112 = vmatpush.bf16.msra.mxu0 %v323_v1  ;;  %v328_v54 = vld [vmem:[%s499_s4] ss:$0 sm:$0xff] }
   0x7   :  { %v332_v24 = vpop.eup %331  ;;  %v329_v57 = vld [vmem:[%s500_s5] ss:$0 sm:$0xff] }
   0x8   :  { %v37_v10 = vld [vmem:[%s496_s8] sm:$0xff]  ;;  %v152_v25 = vmul.f32 32.0, %v332_v24  ;;  %vm156_vm1 = vweird.f32 %v332_v24 }
   0x9   :  { %v38_v13 = vld [vmem:[%s496_s8 + $0x8] sm:$0xff]  ;;  %v330_v62 = vld [vmem:[%s501_s6] ss:$0 sm:$0xff]  ;;  %s256_s6 = ssub.f32 1.0, %s502_s0 }
   0xa   :  { %113 = vmatpush.bf16.msra.mxu0 %v322_v3  ;;  %v153_v26 = vsub.f32 1.0, %v152_v25 }
   0xc   :  { %v154_v27 = vmul.f32 %v332_v24, %v153_v26  ;;  %v257_v26 = vstv %s256_s6 }
   0xe   :  { %114 = vmatpush.bf16.msra.mxu0 %v321_v4  ;;  %v155_v28 = vadd.f32 %v332_v24, %v154_v27 }
  0x10   :  { %v157_v29 = vsel %vm156_vm1, %v332_v24, %v155_v28 }
  0x12   :  { %115 = vmatpush.bf16.msra.mxu0 %v320_v5 }
  0x16   :  { %116 = vmatpush.bf16.msra.mxu0 %v319_v6 }
  0x1a   :  { %117 = vmatpush.bf16.msra.mxu0 %v318_v7 }
  0x1e   :  { %118 = vmatpush.bf16.msra.mxu0 %v317_v8 }
  0x21   :  { %119 = vmatmul.bf16.vlgmr.msra.gmra.mxu0 %v316_v9 }
  0x9e   :  { %v120_v11 = vpop.f32.mrf.mxu0 }
  0x9f   :  { %v125_v12 = vadd.f32 %v120_v11, %v37_v10 }
  0xa1   :  { %128 = vst.msk [vmem:[%s496_s8] sm:$0xff] %vm34_vm0, %v125_v12 }
  0xa6   :  { %v122_v15 = vpop.f32.mrf.mxu0 }
  0xa7   :  { %v126_v16 = vadd.f32 %v122_v15, %v38_v13 }
  0xa8   :  { %v133_v17 = vld [vmem:[%s496_s8] sm:$0xff] }
  0xa9   :  { %129 = vst.msk [vmem:[%s496_s8 + $0x8] sm:$0xff] %vm34_vm0, %v126_v16  ;;  %v447_v18 = vadd.f32 %v327_v14, %v133_v17 }
  0xab   :  { %v145_v19 = vsel %vm34_vm0, %v447_v18, 0.0 }
  0xac   :  { %146 = vadd.xlane.f32.xlu0 %v145_v19 }
  0xb0   :  { %v134_v20 = vld [vmem:[%s496_s8 + $0x8] sm:$0xff] }
  0xb1   :  { %v454_v21 = vadd.f32 %v327_v14, %v134_v20 }
  0xb3   :  { %v148_v22 = vsel %vm34_vm0, %v454_v21, 0.0 }
  0xb4   :  { %149 = vadd.xlane.f32.xlu0 %v148_v22 }
 0x11f   :  { %v147_v30 = vpop.xlane.xlu0 %146 }
 0x120   :  { %v158_v31 = vmul.f32 %v157_v29, %v147_v30 }
 0x122   :  { %v160_v32 = vsub.f32 %v447_v18, %v158_v31 }
 0x124   :  { %v162_v33 = vmul.f32 %v160_v32, %v160_v32 }
 0x126   :  { %v164_v34 = vsel %vm34_vm0, %v162_v33, 0.0  ;;  %v258_v33 = vmul.f32 %v257_v26, %v447_v18 }
 0x127   :  { %165 = vadd.xlane.f32.xlu1 %v164_v34  ;;  %v150_v35 = vpop.xlane.xlu0 %149 }
 0x128   :  { %v159_v36 = vmul.f32 %v157_v29, %v150_v35 }
 0x12a   :  { %v161_v37 = vsub.f32 %v454_v21, %v159_v36 }
 0x12c   :  { %v163_v38 = vmul.f32 %v161_v37, %v161_v37 }
 0x12e   :  { %v167_v39 = vsel %vm34_vm0, %v163_v38, 0.0 }
 0x12f   :  { %168 = vadd.xlane.f32.xlu1 %v167_v39 }
 0x19a   :  { %v166_v40 = vpop.xlane.xlu1 %165 }
 0x19b   :  { %v170_v41 = vmul.f32 %v166_v40, %v157_v29  ;;  %v266_v40 = vld [vmem:[%s503_s7] sm:$0xff] }
 0x19d   :  { %v172_v42 = vadd.f32 1e-05, %v170_v41 }
 0x19f   :  { %333 = vrsqrt.f32 %v172_v42  ;;  %vm180_vm3 = vweird.f32 %v172_v42 }
 0x1a2   :  { %v169_v43 = vpop.xlane.xlu1 %168 }
 0x1a3   :  { %v171_v44 = vmul.f32 %v169_v43, %v157_v29  ;;  %v253_v29 = vstv %s502_s0 }
 0x1a5   :  { %v334_v45 = vpop.eup %333  ;;  %v173_v46 = vadd.f32 1e-05, %v171_v44 }
 0x1a6   :  { %v175_v47 = vmul.f32 %v334_v45, %v172_v42  ;;  %vm181_vm2 = vweird.f32 %v334_v45 }
 0x1a7   :  { %335 = vrsqrt.f32 %v173_v46  ;;  %vm182_vm4 = vmor %vm180_vm3, %vm181_vm2  ;;  %vm190_vm6 = vweird.f32 %v173_v46 }
 0x1a8   :  { %v176_v48 = vmul.f32 %v334_v45, %v175_v47 }
 0x1aa   :  { %v177_v49 = vmul.f32 0.5, %v176_v48 }
 0x1ac   :  { %v178_v50 = vsub.f32 1.5, %v177_v49  ;;  %v267_v49 = vld [vmem:[%s503_s7 + $0x8] sm:$0xff] }
 0x1ad   :  { %v336_v51 = vpop.eup %335 }
 0x1ae   :  { %v179_v52 = vmul.f32 %v334_v45, %v178_v50  ;;  %v185_v53 = vmul.f32 %v336_v51, %v173_v46  ;;  %vm191_vm5 = vweird.f32 %v336_v51  ;;  %v259_v46 = vmul.f32 %v257_v26, %v454_v21 }
 0x1af   :  { %vm192_vm7 = vmor %vm190_vm6, %vm191_vm5 }
 0x1b0   :  { %v183_v55 = vsel %vm182_vm4, %v334_v45, %v179_v52  ;;  %v186_v56 = vmul.f32 %v336_v51, %v185_v53 }
 0x1b1   :  { %v194_v58 = vmul.f32 %v183_v55, %v160_v32 }
 0x1b2   :  { %v187_v59 = vmul.f32 0.5, %v186_v56 }
 0x1b3   :  { %v199_v60 = vmul.f32 %v328_v54, %v194_v58 }
 0x1b4   :  { %v188_v61 = vsub.f32 1.5, %v187_v59 }
 0x1b5   :  { %v204_v63 = vadd.f32 %v329_v57, %v199_v60 }
 0x1b6   :  { %v189_v0 = vmul.f32 %v336_v51, %v188_v61 }
 0x1b7   :  { %v206_v1 = vand.u32 2147483647, %v204_v63 }
 0x1b8   :  { %v193_v2 = vsel %vm192_vm7, %v336_v51, %v189_v0 }
 0x1b9   :  { %v211_v3 = vsub.f32 %v206_v1, %v330_v62  ;;  %v195_v4 = vmul.f32 %v193_v2, %v161_v37 }
 0x1bb   :  { %v312_v5 = vmul.f32 -1.442695, %v211_v3  ;;  %v200_v6 = vmul.f32 %v328_v54, %v195_v4 }
 0x1bd   :  { %337 = vpow2.f32 %v312_v5  ;;  %v205_v7 = vadd.f32 %v329_v57, %v200_v6 }
 0x1bf   :  { %v207_v8 = vand.u32 2147483647, %v205_v7 }
 0x1c1   :  { %v212_v9 = vsub.f32 %v207_v8, %v330_v62 }
 0x1c3   :  { %v338_v10 = vpop.eup %337  ;;  %v313_v11 = vmul.f32 -1.442695, %v212_v9 }
 0x1c4   :  { %v219_v12 = vadd.f32 1.0, %v338_v10 }
 0x1c5   :  { %339 = vpow2.f32 %v313_v11 }
 0x1c6   :  { %341 = vrcp.f32 %v219_v12  ;;  %v232_v19 = vand.u32 2147483648, %v219_v12  ;;  %v230_v22 = vand.u32 2147483647, %v219_v12  ;;  %vm226_vm9 = vweird.f32 %v219_v12 }
 0x1c8   :  { %v233_v25 = vor.u32 1.1754944e-38, %v232_v19  ;;  %vm231_vm11 = vcmp.eq.f32.partialorder %v230_v22, 8.507059e+37 }
 0x1cb   :  { %v340_v13 = vpop.eup %339 }
 0x1cc   :  { %v342_v14 = vpop.eup %341  ;;  %v220_v15 = vadd.f32 1.0, %v340_v13 }
 0x1cd   :  { %v222_v16 = vmul.f32 %v342_v14, %v219_v12  ;;  %vm227_vm8 = vweird.f32 %v342_v14 }
 0x1ce   :  { %343 = vrcp.f32 %v220_v15  ;;  %vm228_vm10 = vmor %vm226_vm9, %vm227_vm8  ;;  %v247_v34 = vand.u32 2147483648, %v220_v15  ;;  %v245_v37 = vand.u32 2147483647, %v220_v15  ;;  %vm241_vm13 = vweird.f32 %v220_v15 }
 0x1cf   :  { %v223_v17 = vsub.f32 1.0, %v222_v16 }
 0x1d0   :  { %v248_v41 = vor.u32 1.1754944e-38, %v247_v34  ;;  %vm246_vm15 = vcmp.eq.f32.partialorder %v245_v37, 8.507059e+37 }
 0x1d1   :  { %v224_v20 = vmul.f32 %v342_v14, %v223_v17 }
 0x1d3   :  { %v225_v23 = vadd.f32 %v342_v14, %v224_v20 }
 0x1d4   :  { %v344_v24 = vpop.eup %343 }
 0x1d5   :  { %v229_v27 = vsel %vm228_vm10, %v342_v14, %v225_v23  ;;  %v237_v28 = vmul.f32 %v344_v24, %v220_v15  ;;  %vm242_vm12 = vweird.f32 %v344_v24 }
 0x1d6   :  { %v234_v30 = vsel %vm231_vm11, %v233_v25, %v229_v27  ;;  %vm243_vm14 = vmor %vm241_vm13, %vm242_vm12 }
 0x1d7   :  { %v251_v31 = vmul.f32 %v234_v30, %v447_v18  ;;  %v238_v32 = vsub.f32 1.0, %v237_v28 }
 0x1d9   :  { %v254_v35 = vmul.f32 %v253_v29, %v251_v31  ;;  %v239_v36 = vmul.f32 %v344_v24, %v238_v32 }
 0x1db   :  { %v260_v38 = vadd.f32 %v258_v33, %v254_v35  ;;  %v240_v39 = vadd.f32 %v344_v24, %v239_v36 }
 0x1dd   :  { %v314_v42 = vclamps-f32 %v260_v38, 100.0  ;;  %v244_v43 = vsel %vm243_vm14, %v344_v24, %v240_v39 }
 0x1de   :  { %v249_v44 = vsel %vm246_vm15, %v248_v41, %v244_v43 }
 0x1df   :  { %v268_v45 = vadd.f32 %v314_v42, %v266_v40  ;;  %v252_v18 = vmul.f32 %v249_v44, %v454_v21 }
 0x1e1   :  { %270 = vst.msk [vmem:[%s496_s8] sm:$0xff] %vm34_vm0, %v268_v45  ;;  %v255_v47 = vmul.f32 %v253_v29, %v252_v18 }
 0x1e3   :  { %v261_v48 = vadd.f32 %v259_v46, %v255_v47 }
 0x1e5   :  { %v315_v50 = vclamps-f32 %v261_v48, 100.0 }
 0x1e7   :  { %v269_v51 = vadd.f32 %v315_v50, %v267_v49 }
 0x1e9   :  { %271 = vst.msk [vmem:[%s496_s8 + $0x8] sm:$0xff] %vm34_vm0, %v269_v51 }

// kernel: byte_transformer_forward.22
= control target key start
LH: loop header
LB: loop body
LE: loop exit
PB: predicated region body
PF: predicated region fallthrough
CT: control target
= control target key end

     0   :  { %vm27_vm0 = vcmask 261120   ;;  %v180_v4 = vmov 32.0   ;;  %s254_s1 = inlined_call_operand.vmem [shape: f32[16,32], index: 1, kind: input, shape index: {}]   ;;  %s255_s2 = inlined_call_operand.vmem [shape: f32[1,32], index: 2, kind: input, shape index: {}]   ;;  %s256_s3 = inlined_call_operand.vmem [shape: f32[1,32], index: 3, kind: input, shape index: {}]   ;;  %s257_s4 = inlined_call_operand.vmem [shape: f32[1,32], index: 4, kind: input, shape index: {}]   ;;  %s258_s0 = inlined_call_operand.<no memory space> [shape: f32[1], index: 0, kind: input, shape index: {}]   ;;  %s259_s5 = inlined_call_operand.vmem [shape: bf16[16,32], index: 5, kind: output, shape index: {}]  }
   0x1   :  { %v214_v0 = vld [vmem:[%s254_s1] sm:$0xff]  ;;  %v221_v2 = vld [vmem:[%s254_s1 + $0x8] sm:$0xff]  ;;  %166 = vrcp.f32 %v180_v4 }
   0x2   :  { %v28_v1 = vsel %vm27_vm0, %v214_v0, 0.0  ;;  %v31_v3 = vsel %vm27_vm0, %v221_v2, 0.0  ;;  %v163_v35 = vld [vmem:[%s255_s2] ss:$0 sm:$0xff] }
   0x3   :  { %29 = vadd.xlane.f32.xlu0 %v28_v1  ;;  %v164_v38 = vld [vmem:[%s256_s3] ss:$0 sm:$0xff] }
   0x4   :  { %v165_v43 = vld [vmem:[%s257_s4] ss:$0 sm:$0xff]  ;;  %s139_s4 = ssub.f32 1.0, %s258_s0 }
   0x7   :  { %v167_v5 = vpop.eup %166 }
   0x8   :  { %v35_v6 = vmul.f32 32.0, %v167_v5  ;;  %vm39_vm1 = vweird.f32 %v167_v5 }
   0xa   :  { %v36_v7 = vsub.f32 1.0, %v35_v6  ;;  %v140_v6 = vstv %s139_s4 }
   0xb   :  { %32 = vadd.xlane.f32.xlu0 %v31_v3 }
   0xc   :  { %v37_v8 = vmul.f32 %v167_v5, %v36_v7 }
   0xe   :  { %v38_v9 = vadd.f32 %v167_v5, %v37_v8 }
  0x10   :  { %v40_v10 = vsel %vm39_vm1, %v167_v5, %v38_v9 }
  0x76   :  { %v30_v11 = vpop.xlane.xlu0 %29 }
  0x77   :  { %v41_v12 = vmul.f32 %v40_v10, %v30_v11 }
  0x79   :  { %v43_v13 = vsub.f32 %v214_v0, %v41_v12  ;;  %v141_v12 = vmul.f32 %v140_v6, %v214_v0 }
  0x7b   :  { %v45_v14 = vmul.f32 %v43_v13, %v43_v13 }
  0x7d   :  { %v47_v15 = vsel %vm27_vm0, %v45_v14, 0.0 }
  0x7e   :  { %48 = vadd.xlane.f32.xlu1 %v47_v15  ;;  %v33_v16 = vpop.xlane.xlu0 %32 }
  0x7f   :  { %v42_v17 = vmul.f32 %v40_v10, %v33_v16 }
  0x81   :  { %v44_v18 = vsub.f32 %v221_v2, %v42_v17 }
  0x83   :  { %v46_v19 = vmul.f32 %v44_v18, %v44_v18 }
  0x85   :  { %v50_v20 = vsel %vm27_vm0, %v46_v19, 0.0  ;;  %vm151_vm0 = vcmask 257024  }
  0x86   :  { %51 = vadd.xlane.f32.xlu1 %v50_v20 }
  0xf1   :  { %v49_v21 = vpop.xlane.xlu1 %48 }
  0xf2   :  { %v53_v22 = vmul.f32 %v49_v21, %v40_v10 }
  0xf4   :  { %v55_v23 = vadd.f32 1e-05, %v53_v22 }
  0xf6   :  { %168 = vrsqrt.f32 %v55_v23  ;;  %vm63_vm3 = vweird.f32 %v55_v23 }
  0xf9   :  { %v52_v24 = vpop.xlane.xlu1 %51 }
  0xfa   :  { %v54_v25 = vmul.f32 %v52_v24, %v40_v10  ;;  %v136_v10 = vstv %s258_s0 }
  0xfc   :  { %v169_v26 = vpop.eup %168  ;;  %v56_v27 = vadd.f32 1e-05, %v54_v25  ;;  %v142_v25 = vmul.f32 %v140_v6, %v221_v2 }
  0xfd   :  { %v58_v28 = vmul.f32 %v169_v26, %v55_v23  ;;  %vm64_vm2 = vweird.f32 %v169_v26 }
  0xfe   :  { %170 = vrsqrt.f32 %v56_v27  ;;  %vm65_vm4 = vmor %vm63_vm3, %vm64_vm2  ;;  %vm73_vm6 = vweird.f32 %v56_v27 }
  0xff   :  { %v59_v29 = vmul.f32 %v169_v26, %v58_v28 }
 0x101   :  { %v60_v30 = vmul.f32 0.5, %v59_v29 }
 0x103   :  { %v61_v31 = vsub.f32 1.5, %v60_v30 }
 0x104   :  { %v171_v32 = vpop.eup %170 }
 0x105   :  { %v62_v33 = vmul.f32 %v169_v26, %v61_v31  ;;  %v68_v34 = vmul.f32 %v171_v32, %v56_v27  ;;  %vm74_vm5 = vweird.f32 %v171_v32 }
 0x106   :  { %vm75_vm7 = vmor %vm73_vm6, %vm74_vm5 }
 0x107   :  { %v66_v36 = vsel %vm65_vm4, %v169_v26, %v62_v33  ;;  %v69_v37 = vmul.f32 %v171_v32, %v68_v34 }
 0x108   :  { %v77_v39 = vmul.f32 %v66_v36, %v43_v13 }
 0x109   :  { %v70_v40 = vmul.f32 0.5, %v69_v37 }
 0x10a   :  { %v82_v41 = vmul.f32 %v163_v35, %v77_v39 }
 0x10b   :  { %v71_v42 = vsub.f32 1.5, %v70_v40 }
 0x10c   :  { %v87_v44 = vadd.f32 %v164_v38, %v82_v41 }
 0x10d   :  { %v72_v45 = vmul.f32 %v171_v32, %v71_v42 }
 0x10e   :  { %v89_v46 = vand.u32 2147483647, %v87_v44 }
 0x10f   :  { %v76_v47 = vsel %vm75_vm7, %v171_v32, %v72_v45 }
 0x110   :  { %v94_v48 = vsub.f32 %v89_v46, %v165_v43  ;;  %v78_v49 = vmul.f32 %v76_v47, %v44_v18 }
 0x112   :  { %v158_v50 = vmul.f32 -1.442695, %v94_v48  ;;  %v83_v51 = vmul.f32 %v163_v35, %v78_v49 }
 0x114   :  { %172 = vpow2.f32 %v158_v50  ;;  %v88_v52 = vadd.f32 %v164_v38, %v83_v51 }
 0x116   :  { %v90_v53 = vand.u32 2147483647, %v88_v52 }
 0x118   :  { %v95_v54 = vsub.f32 %v90_v53, %v165_v43 }
 0x11a   :  { %v173_v55 = vpop.eup %172  ;;  %v159_v56 = vmul.f32 -1.442695, %v95_v54 }
 0x11b   :  { %v102_v57 = vadd.f32 1.0, %v173_v55 }
 0x11c   :  { %174 = vpow2.f32 %v159_v56 }
 0x11d   :  { %176 = vrcp.f32 %v102_v57  ;;  %v115_v63 = vand.u32 2147483648, %v102_v57  ;;  %v113_v3 = vand.u32 2147483647, %v102_v57  ;;  %vm109_vm9 = vweird.f32 %v102_v57 }
 0x11f   :  { %v116_v7 = vor.u32 1.1754944e-38, %v115_v63  ;;  %vm114_vm11 = vcmp.eq.f32.partialorder %v113_v3, 8.507059e+37 }
 0x122   :  { %v175_v58 = vpop.eup %174 }
 0x123   :  { %v177_v59 = vpop.eup %176  ;;  %v103_v60 = vadd.f32 1.0, %v175_v58 }
 0x124   :  { %v105_v61 = vmul.f32 %v177_v59, %v102_v57  ;;  %vm110_vm8 = vweird.f32 %v177_v59 }
 0x125   :  { %178 = vrcp.f32 %v103_v60  ;;  %vm111_vm10 = vmor %vm109_vm9, %vm110_vm8  ;;  %v130_v15 = vand.u32 2147483648, %v103_v60  ;;  %v128_v18 = vand.u32 2147483647, %v103_v60  ;;  %vm124_vm13 = vweird.f32 %v103_v60 }
 0x126   :  { %v106_v62 = vsub.f32 1.0, %v105_v61 }
 0x127   :  { %v131_v21 = vor.u32 1.1754944e-38, %v130_v15  ;;  %vm129_vm15 = vcmp.eq.f32.partialorder %v128_v18, 8.507059e+37 }
 0x128   :  { %v107_v1 = vmul.f32 %v177_v59, %v106_v62 }
 0x12a   :  { %v108_v4 = vadd.f32 %v177_v59, %v107_v1 }
 0x12b   :  { %v179_v5 = vpop.eup %178 }
 0x12c   :  { %v112_v8 = vsel %vm111_vm10, %v177_v59, %v108_v4  ;;  %v120_v9 = vmul.f32 %v179_v5, %v103_v60  ;;  %vm125_vm12 = vweird.f32 %v179_v5 }
 0x12d   :  { %v117_v11 = vsel %vm114_vm11, %v116_v7, %v112_v8  ;;  %vm126_vm14 = vmor %vm124_vm13, %vm125_vm12 }
 0x12e   :  { %v134_v13 = vmul.f32 %v117_v11, %v214_v0  ;;  %v121_v14 = vsub.f32 1.0, %v120_v9 }
 0x130   :  { %v137_v16 = vmul.f32 %v136_v10, %v134_v13  ;;  %v122_v17 = vmul.f32 %v179_v5, %v121_v14 }
 0x132   :  { %v143_v19 = vadd.f32 %v141_v12, %v137_v16  ;;  %v123_v20 = vadd.f32 %v179_v5, %v122_v17 }
 0x134   :  { %v160_v22 = vclamps-f32 %v143_v19, 100.0  ;;  %v127_v23 = vsel %vm126_vm14, %v179_v5, %v123_v20 }
 0x135   :  { %v132_v24 = vsel %vm129_vm15, %v131_v21, %v127_v23 }
 0x136   :  { %v149_v26 = vpack.c.bf16 %v160_v22, %v160_v22  ;;  %v135_v0 = vmul.f32 %v132_v24, %v221_v2 }
 0x138   :  { %152 = vst.msk [vmem:[%s259_s5] sm:$0xf] %vm151_vm0, %v149_v26  ;;  %v138_v27 = vmul.f32 %v136_v10, %v135_v0 }
 0x13a   :  { %v144_v28 = vadd.f32 %v142_v25, %v138_v27 }
 0x13c   :  { %v161_v29 = vclamps-f32 %v144_v28, 100.0 }
 0x13e   :  { %v150_v30 = vpack.c.bf16 %v161_v29, %v161_v29 }
 0x140   :  { %153 = vst.msk [vmem:[%s259_s5 + $0x4] sm:$0xf] %vm151_vm0, %v150_v30 }

// kernel: byte_transformer_forward.23
= control target key start
LH: loop header
LB: loop body
LE: loop exit
PB: predicated region body
PF: predicated region fallthrough
CT: control target
= control target key end

     0   :  { %vm20_vm0 = vcmask 523264   ;;  %v149_v1 = vmov 0.0   ;;  %s194_s0 = inlined_call_operand.vmem [shape: bf16[16,32], index: 0, kind: input, shape index: {}]   ;;  %s195_s1 = inlined_call_operand.vmem [shape: bf16[32,64], index: 1, kind: input, shape index: {}]   ;;  %s196_s2 = inlined_call_operand.vmem [shape: f32[1,64], index: 2, kind: input, shape index: {}]   ;;  %s197_s3 = inlined_call_operand.hbm [shape: f32[16,64], index: 3, kind: output, shape index: {}]  }
   0x1   :  { %v117_v0 = vld [vmem:[%s195_s1 + $0x8] sm:$0xff]  ;;  %21 = vst.msk [vmem:[#allocation2] sm:$0xff] %vm20_vm0, %v149_v1 }
   0x2   :  { %8 = vsyncpa [#allocation3], 0  ;;  %58 = vmatpush.bf16.msra.mxu0 %v117_v0  ;;  %v116_v2 = vld [vmem:[%s195_s1] sm:$0xff]  ;;  %22 = vst.msk [vmem:[#allocation2 + $0x8] sm:$0xff] %vm20_vm0, %v149_v1  ;;  %vm48_vm1 = vcmask 261120   ;;  %s90_s22 = sshll.u32 %s197_s3, 4  ;;  %s91_s22 = int_to_ptr.hbm [resolvable:$true] %s90_s22 }
   0x3   :  { %v115_v3 = vld [vmem:[%s194_s0] sm:$0xff]  ;;  %s150_s0 = smov [#allocation2]   ;;  %s152_s23 = smov 8  }
   0x4   :  { %v122_v8 = vld [vmem:[%s196_s2] ss:$0 sm:$0xff]  ;;  %s88_s1 = sshll.u32 %s150_s0, 4  ;;  %s151_s2 = smov 128   ;;  %s89_s1 = int_to_ptr.vmem [resolvable:$true] %s88_s1 }
   0x6   :  { %59 = vmatpush.bf16.msra.mxu0 %v116_v2 }
   0x8   :  { %v23_v4 = vld [vmem:[#allocation2] sm:$0xff] }
   0x9   :  { %114 = vmatmul.msk.bf16.vlgmr.msra.gmra.mxu0 %vm48_vm1, %v115_v3  ;;  %v24_v7 = vld [vmem:[#allocation2 + $0x8] sm:$0xff] }
  0x86   :  { %v61_v5 = vpop.f32.mrf.mxu0 }
  0x87   :  { %v66_v6 = vadd.f32 %v61_v5, %v23_v4 }
  0x89   :  { %69 = vst.msk [vmem:[#allocation2] sm:$0xff] %vm20_vm0, %v66_v6 }
  0x8e   :  { %v63_v9 = vpop.f32.mrf.mxu0 }
  0x8f   :  { %v67_v10 = vadd.f32 %v63_v9, %v24_v7 }
  0x90   :  { %v74_v11 = vld [vmem:[#allocation2] sm:$0xff] }
  0x91   :  { %v80_v12 = vadd.f32 %v122_v8, %v74_v11  ;;  %70 = vst.msk [vmem:[#allocation2 + $0x8] sm:$0xff] %vm20_vm0, %v67_v10 }
  0x93   :  { %82 = vst.msk [vmem:[#allocation2] sm:$0xff] %vm20_vm0, %v80_v12 }
  0x98   :  { %v75_v13 = vld [vmem:[#allocation2 + $0x8] sm:$0xff] }
  0x99   :  { %v81_v14 = vadd.f32 %v122_v8, %v75_v13 }
  0x9b   :  { %83 = vst.msk [vmem:[#allocation2 + $0x8] sm:$0xff] %vm20_vm0, %v81_v14 }
  0x9c   :  { %96 = dma.vmem_to_hbm [thread:$0]  %s89_s1, 256, %s91_s22, [#allocation3], %s151_s2, %s151_s2, %s152_s23  }
  0x9d   :  { %147 = dma.done.wait [#allocation3], 256  }
  0x9e   :  { %148 = vsyncadd [#allocation3], 4294967040 }
  0x9f   :  { %101 = vsyncpa [#allocation3], 1 }

</bundles_post_ra>
